<compile_context>
chip_gen: v6e
topology: v6e:2x2x1
jax: 0.10.0
libtpu: 0.0.40
codegen_flags: <defaults>
</compile_context>

<pallas_src>
import math

import jax
import jax.numpy as jnp
from jax import lax
from jax.experimental import pallas as pl
from jax.experimental.pallas import tpu as pltpu


def _round_up(x, m=128):
    return ((x + m - 1) // m) * m


# ---------------------------------------------------------------------------
# Parameter packing: one bf16 weight slab (dim rows) + one f32 bias slab.
# Every block starts at a 128-multiple column; zero padding keeps padded math
# exact.  Fused blocks place [msg.l1 | GRU W_hh] adjacently so each half-round
# needs a single wide matmul against the pre-update hidden state.
# ---------------------------------------------------------------------------
def pack_params(params, dim, dim_agg, dim_class, out_width=128):
    (Wi, bi,
     fmW1, fmb1, fmW2, fmb2,
     bmW1, bmb1, bmW2, bmb2,
     fgWir, fgWiz, fgWin, fgWhr, fgWhz, fgWhn,
     fgbir, fgbiz, fgbin, fgbhr, fgbhz, fgbhn,
     bgWir, bgWiz, bgWin, bgWhr, bgWhz, bgWhn,
     bgbir, bgbiz, bgbin, bgbhr, bgbhz, bgbhn,
     clW1, clb1, clW2, clb2) = params

    assert dim_agg <= dim and dim_class <= dim, \
        "packing assumes dim_agg, dim_class <= dim (true for the module defaults)"

    cat = lambda xs: jnp.concatenate(xs, axis=1)
    fgWh, fgbh = cat([fgWhr, fgWhz, fgWhn]), cat([fgbhr, fgbhz, fgbhn])
    fgWi, fgbi = cat([fgWir, fgWiz, fgWin]), cat([fgbir, fgbiz, fgbin])
    bgWh, bgbh = cat([bgWhr, bgWhz, bgWhn]), cat([bgbhr, bgbhz, bgbhn])
    bgWi, bgbi = cat([bgWir, bgWiz, bgWin]), cat([bgbir, bgbiz, bgbin])

    w_chunks, b_chunks, offs = [], [], {}
    cursor = 0

    def add(name, w, b, pad_cols, view_width):
        nonlocal cursor
        r, c = w.shape
        assert r <= dim and c <= pad_cols and b.shape == (1, c)
        w_chunks.append(jnp.pad(w, ((0, dim - r), (0, pad_cols - c))))
        b_chunks.append(jnp.pad(b, ((0, 0), (0, pad_cols - c))))
        offs[name] = (cursor, view_width)
        cursor += pad_cols

    P1 = _round_up(dim)         # padded width of a "dim-ish" column block
    P3 = _round_up(3 * dim)     # padded width of a fused-GRU-gate column block

    # init Linear: 4 -> dim  (rows padded 4->dim; feat is padded to dim cols)
    add("init", Wi, bi, P1, dim)
    # fused forward block: [forward_msg.l1 | forward GRU W_hh]
    f0 = cursor
    add("_fm1", fmW1, fmb1, P1, dim_agg)
    add("_fgWh", fgWh, fgbh, P3, 3 * dim)
    offs["fwd_fused"] = (f0, cursor - f0)
    # forward_msg.l2 (rows padded dim_agg->dim) and forward GRU W_ih
    add("fm2", fmW2, fmb2, P1, dim)
    add("fgWi", fgWi, fgbi, P3, 3 * dim)
    # fused backward block: [backward_msg.l1 | backward GRU W_hh]
    b0 = cursor
    add("_bm1", bmW1, bmb1, P1, dim_agg)
    add("_bgWh", bgWh, bgbh, P3, 3 * dim)
    offs["bwd_fused"] = (b0, cursor - b0)
    # backward_msg.l2 and backward GRU W_ih
    add("bm2", bmW2, bmb2, P1, dim)
    add("bgWi", bgWi, bgbi, P3, 3 * dim)
    # classifier: dim -> dim_class -> 1 (output block kept lane-dense at 128)
    add("cl1", clW1, clb1, P1, dim)
    add("cl2", clW2, clb2, out_width, out_width)

    offs["_gh_rel"] = (P1, 3 * dim)   # W_hh offset inside a fused block

    w_slab = jnp.concatenate(w_chunks, axis=1).astype(jnp.bfloat16)
    b_slab = jnp.concatenate(b_chunks, axis=1).astype(jnp.float32)
    return w_slab, b_slab, offs


# ---------------------------------------------------------------------------
# Kernel
# ---------------------------------------------------------------------------
def make_circuitsat_kernel(n_rounds, dim, dim_agg, offs, unroll_rounds=4):
    gh_rel = offs["_gh_rel"][0]

    def kernel(feat_ref, adj_ref, w_ref, b_ref, out_ref):
        def wv(name):
            s, w = offs[name]
            return w_ref[:, s:s + w]      # ref slice -> vld placed near use (bf16)

        def bv(name):
            s, w = offs[name]
            return b_ref[:, s:s + w]      # f32 bias row

        def dotf(x, w):
            # bf16 MXU operands, f32 accumulation.
            return jnp.dot(x.astype(jnp.bfloat16), w,
                           preferred_element_type=jnp.float32)

        def sigm(x):
            # Exact sigmoid: avoids approx-reciprocal error compounding across
            # the 2*n_rounds recurrent GRU steps (EUP has plenty of slack).
            return 1.0 / (1.0 + jnp.exp(-x))

        adj = adj_ref[...]               # (N, N) bf16 (cast once in the wrapper)
        feat = feat_ref[...]             # (N, dim) f32 zero-padded one-hot

        # h = init(features)
        h = dotf(feat, wv("init")) + bv("init")

        def half_round(h, fused, w2, wi, transposed):
            # One wide matmul against the pre-update hidden state:
            #   h @ [msg.l1 | GRU W_hh]   (fused same-LHS matmuls)
            x = dotf(h, wv(fused)) + bv(fused)
            # cols dim_agg..dim-1 of the msg.l1 sub-block are zero-padded, so
            # the extra hidden lanes stay exactly 0 and the math is exact.
            hid = jnp.maximum(x[:, 0:dim], 0.0)
            gh = x[:, gh_rel:gh_rel + 3 * dim]           # r|z|n hidden-path gates
            pre = (dotf(hid, wv(w2)) + bv(w2)).astype(jnp.bfloat16)
            if transposed:
                # adj^T @ pre as a contraction over adj's dim 0 -> no second
                # resident (N, N) copy and no materialized transpose.
                msg = lax.dot_general(adj, pre, (((0,), (0,)), ((), ())),
                                      preferred_element_type=jnp.float32)
            else:
                msg = jnp.dot(adj, pre, preferred_element_type=jnp.float32)
            gi = dotf(msg, wv(wi)) + bv(wi)               # r|z|n input-path gates
            # PyTorch GRU gate order (r, z, n)
            r = sigm(gi[:, 0:dim] + gh[:, 0:dim])
            z = sigm(gi[:, dim:2 * dim] + gh[:, dim:2 * dim])
            n = jnp.tanh(gi[:, 2 * dim:3 * dim] + r * gh[:, 2 * dim:3 * dim])
            return (1.0 - z) * n + z * h

        def round_body(hh):
            hh = half_round(hh, "fwd_fused", "fm2", "fgWi", transposed=False)
            hh = half_round(hh, "bwd_fused", "bm2", "bgWi", transposed=True)
            return hh

        if n_rounds <= unroll_rounds:
            for _ in range(n_rounds):          # small round count: unroll
                h = round_body(h)
        else:
            # larger round counts: bound live ranges / code size
            h = lax.fori_loop(0, n_rounds, lambda _, hh: round_body(hh), h)

        # classif MLP: dim -> dim_class -> 1, stored lane-dense as (N, 128)
        # (only column 0 is meaningful; wrapper slices it).
        hid = jnp.maximum(dotf(h, wv("cl1")) + bv("cl1"), 0.0)
        out_ref[...] = dotf(hid, wv("cl2")) + bv("cl2")

    return kernel


# ---------------------------------------------------------------------------
# Wrapper: one pallas_call over a batch of graphs (grid axis = graph index).
# ---------------------------------------------------------------------------
def circuitsat_forward(features, adj, params, n_rounds, dim, dim_agg, dim_class):
    """features: (B, N, 4) one-hot f32; adj: (B, N, N) 0/1 f32. Returns (B, N, 1)."""
    B, N, feat_dim = features.shape
    out_width = 128
    w_slab, b_slab, offs = pack_params(params, dim, dim_agg, dim_class, out_width)
    w_total = w_slab.shape[1]

    feat_pad = jnp.pad(features, ((0, 0), (0, 0), (0, dim - feat_dim)))
    # 0/1 adjacency is exact in bf16: halves the O(N^2) DMA + VMEM footprint.
    adj_bf = adj.astype(jnp.bfloat16)

    kernel = make_circuitsat_kernel(n_rounds, dim, dim_agg, offs)
    out = pl.pallas_call(
        kernel,
        out_shape=jax.ShapeDtypeStruct((B, N, out_width), jnp.float32),
        grid=(B,),
        in_specs=[
            pl.BlockSpec((None, N, dim), lambda b: (b, 0, 0)),       # features
            pl.BlockSpec((None, N, N), lambda b: (b, 0, 0)),         # adj (bf16)
            pl.BlockSpec((dim, w_total), lambda b: (0, 0)),          # weight slab
            pl.BlockSpec((1, w_total), lambda b: (0, 0)),            # bias slab
        ],
        out_specs=pl.BlockSpec((None, N, out_width), lambda b: (b, 0, 0)),
        compiler_params=pltpu.CompilerParams(
            # graph axis is independent -> megacore shard on v7x, pipelined DMA
            dimension_semantics=("parallel",),
            vmem_limit_bytes=32 * 1024 * 1024,   # tiny footprint; safe on all gens
        ),
    )(feat_pad, adj_bf, w_slab, b_slab)
    return out[:, :, :1]    # lane-dense kernel store; slice to the true output


# ---------------------------------------------------------------------------
# Parameter init (PyTorch-style) and pure-JAX f32 reference.
# ---------------------------------------------------------------------------
def init_params(key, dim, dim_agg, dim_class):
    keys = iter(jax.random.split(key, 64))

    def U(shape, fan_in):
        b = 1.0 / math.sqrt(fan_in)
        return jax.random.uniform(next(keys), shape, jnp.float32, -b, b)

    p = []
    p += [U((4, dim), 4), U((1, dim), 4)]                              # init
    p += [U((dim, dim_agg), dim), U((1, dim_agg), dim),                # fwd msg
          U((dim_agg, dim), dim_agg), U((1, dim), dim_agg)]
    p += [U((dim, dim_agg), dim), U((1, dim_agg), dim),                # bwd msg
          U((dim_agg, dim), dim_agg), U((1, dim), dim_agg)]
    for _ in range(2):                                                 # fwd/bwd GRU
        p += [U((dim, dim), dim) for _ in range(6)]
        p += [U((1, dim), dim) for _ in range(6)]
    p += [U((dim, dim_class), dim), U((1, dim_class), dim),            # classif
          U((dim_class, 1), dim_class), U((1, 1), dim_class)]
    return p


def circuitsat_reference(features, adj, params, n_rounds):
    (Wi, bi,
     fmW1, fmb1, fmW2, fmb2,
     bmW1, bmb1, bmW2, bmb2,
     fgWir, fgWiz, fgWin, fgWhr, fgWhz, fgWhn,
     fgbir, fgbiz, fgbin, fgbhr, fgbhz, fgbhn,
     bgWir, bgWiz, bgWin, bgWhr, bgWhz, bgWhn,
     bgbir, bgbiz, bgbin, bgbhr, bgbhz, bgbhn,
     clW1, clb1, clW2, clb2) = params

    lin = lambda x, w, b: x @ w + b
    mlp = lambda x, w1, b1, w2, b2: lin(jnp.maximum(lin(x, w1, b1), 0.0), w2, b2)
    sigm = lambda x: 1.0 / (1.0 + jnp.exp(-x))

    def gru(x, h, Wir, Wiz, Win, Whr, Whz, Whn, bir, biz, bin_, bhr, bhz, bhn):
        r = sigm(lin(x, Wir, bir) + lin(h, Whr, bhr))
        z = sigm(lin(x, Wiz, biz) + lin(h, Whz, bhz))
        n = jnp.tanh(lin(x, Win, bin_) + r * lin(h, Whn, bhn))
        return (1.0 - z) * n + z * h

    h = lin(features, Wi, bi)
    for _ in range(n_rounds):
        f_msg = adj @ mlp(h, fmW1, fmb1, fmW2, fmb2)
        h = gru(f_msg, h, fgWir, fgWiz, fgWin, fgWhr, fgWhz, fgWhn,
                fgbir, fgbiz, fgbin, fgbhr, fgbhz, fgbhn)
        b_msg = adj.T @ mlp(h, bmW1, bmb1, bmW2, bmb2)
        h = gru(b_msg, h, bgWir, bgWiz, bgWin, bgWhr, bgWhz, bgWhn,
                bgbir, bgbiz, bgbin, bgbhr, bgbhz, bgbhn)
    return mlp(h, clW1, clb1, clW2, clb2)


if __name__ == "__main__":
    # Small synthetic shapes consistent with the module's forward:
    # B graphs of N nodes each, one-hot feature size 4, dim=32, dim_agg=16,
    # dim_class=8, n_rounds=3.
    B, N, DIM, DIM_AGG, DIM_CLASS, N_ROUNDS = 2, 16, 32, 16, 8, 3

    key = jax.random.PRNGKey(0)
    k_feat, k_adj, k_par = jax.random.split(key, 3)

    labels = jax.random.randint(k_feat, (B, N), 0, 4)
    features = jax.nn.one_hot(labels, 4, dtype=jnp.float32)           # (B, N, 4)
    adj = (jax.random.uniform(k_adj, (B, N, N)) < 0.3).astype(jnp.float32)

    params = init_params(k_par, DIM, DIM_AGG, DIM_CLASS)

    out = circuitsat_forward(features, adj, params, N_ROUNDS, DIM, DIM_AGG, DIM_CLASS)
    out = jax.block_until_ready(out)

    ref = jnp.stack([circuitsat_reference(features[b], adj[b], params, N_ROUNDS)
                     for b in range(B)])

    assert out.shape == (B, N, 1)
    assert bool(jnp.all(jnp.isfinite(out)))
    # bf16 matmul operands accumulate rounding through the recurrence -> relaxed
    # tolerance vs. the f32 reference (adj is exact in bf16 since it is 0/1).
    assert jnp.allclose(out, ref, atol=5e-2, rtol=5e-2), (out, ref)

    print("KERNEL_OK")
</pallas_src>

<mosaic_0001>
module attributes {stable_mosaic.version = 11 : i64} {
  func.func @kernel(%arg0: i32, %arg1: memref<1x16x32xf32, #tpu.memory_space<vmem>>, %arg2: memref<1x16x16xbf16, #tpu.memory_space<vmem>>, %arg3: memref<32x1408xbf16, #tpu.memory_space<vmem>>, %arg4: memref<1x1408xf32, #tpu.memory_space<vmem>>, %arg5: memref<1x16x128xf32, #tpu.memory_space<vmem>>) attributes {dimension_semantics = [#tpu.dimension_semantics<parallel>], iteration_bounds = array<i64: 2>, scalar_prefetch = 0 : i64, scratch_operands = 0 : i64, tpu.core_type = #tpu.core_type<tc>, window_params = [{transform_indices = @transform_0, window_bounds = array<i64: 1, 16, 32>}, {transform_indices = @transform_1, window_bounds = array<i64: 1, 16, 16>}, {pipeline_mode = #tpu.pipeline_mode<synchronous>, transform_indices = @transform_2, window_bounds = array<i64: 32, 1408>}, {pipeline_mode = #tpu.pipeline_mode<synchronous>, transform_indices = @transform_3, window_bounds = array<i64: 1, 1408>}, {transform_indices = @transform_4, window_bounds = array<i64: 1, 16, 128>}]} {
    %c0 = arith.constant 0 : index
    %c0_0 = arith.constant 0 : index
    %c0_1 = arith.constant 0 : index
    %0 = vector.load %arg2[%c0, %c0_0, %c0_1] : memref<1x16x16xbf16, #tpu.memory_space<vmem>>, vector<1x16x16xbf16>
    %1 = vector.shape_cast %0 : vector<1x16x16xbf16> to vector<16x16xbf16>
    %c0_2 = arith.constant 0 : index
    %c0_3 = arith.constant 0 : index
    %c0_4 = arith.constant 0 : index
    %2 = vector.load %arg1[%c0_2, %c0_3, %c0_4] : memref<1x16x32xf32, #tpu.memory_space<vmem>>, vector<1x16x32xf32>
    %3 = vector.shape_cast %2 : vector<1x16x32xf32> to vector<16x32xf32>
    %c0_5 = arith.constant 0 : index
    %c0_6 = arith.constant 0 : index
    %4 = vector.load %arg3[%c0_5, %c0_6] : memref<32x1408xbf16, #tpu.memory_space<vmem>>, vector<32x32xbf16>
    %5 = arith.truncf %3 : vector<16x32xf32> to vector<16x32xbf16>
    %cst = arith.constant dense<0.000000e+00> : vector<16x32xf32>
    %6 = tpu.matmul %5, %4, %cst {dimension_numbers = #tpu.dot_dimension_numbers<[1], [0], [0], [1], [0, 0, 1, 1], [], []>} : vector<16x32xbf16>, vector<32x32xbf16>, vector<16x32xf32> -> vector<16x32xf32>
    %c0_7 = arith.constant 0 : index
    %c0_8 = arith.constant 0 : index
    %7 = vector.load %arg4[%c0_7, %c0_8] : memref<1x1408xf32, #tpu.memory_space<vmem>>, vector<1x32xf32>
    %8 = vector.broadcast %7 : vector<1x32xf32> to vector<16x32xf32>
    %9 = arith.addf %6, %8 : vector<16x32xf32>
    %c0_9 = arith.constant 0 : index
    %c128 = arith.constant 128 : index
    %10 = vector.load %arg3[%c0_9, %c128] : memref<32x1408xbf16, #tpu.memory_space<vmem>>, vector<32x256xbf16>
    %11 = arith.truncf %9 : vector<16x32xf32> to vector<16x32xbf16>
    %cst_10 = arith.constant dense<0.000000e+00> : vector<16x256xf32>
    %12 = tpu.matmul %11, %10, %cst_10 {dimension_numbers = #tpu.dot_dimension_numbers<[1], [0], [0], [1], [0, 0, 1, 1], [], []>} : vector<16x32xbf16>, vector<32x256xbf16>, vector<16x256xf32> -> vector<16x256xf32>
    %c0_11 = arith.constant 0 : index
    %c128_12 = arith.constant 128 : index
    %13 = vector.load %arg4[%c0_11, %c128_12] : memref<1x1408xf32, #tpu.memory_space<vmem>>, vector<1x256xf32>
    %14 = vector.broadcast %13 : vector<1x256xf32> to vector<16x256xf32>
    %15 = arith.addf %12, %14 : vector<16x256xf32>
    %16 = vector.extract_strided_slice %15 {offsets = [0, 0], sizes = [16, 32], strides = [1, 1]} : vector<16x256xf32> to vector<16x32xf32>
    %cst_13 = arith.constant 0.000000e+00 : f32
    %17 = vector.broadcast %cst_13 : f32 to vector<16x32xf32>
    %18 = arith.maximumf %16, %17 : vector<16x32xf32>
    %19 = vector.extract_strided_slice %15 {offsets = [0, 128], sizes = [16, 96], strides = [1, 1]} : vector<16x256xf32> to vector<16x96xf32>
    %c0_14 = arith.constant 0 : index
    %c384 = arith.constant 384 : index
    %20 = vector.load %arg3[%c0_14, %c384] : memref<32x1408xbf16, #tpu.memory_space<vmem>>, vector<32x32xbf16>
    %21 = arith.truncf %18 : vector<16x32xf32> to vector<16x32xbf16>
    %cst_15 = arith.constant dense<0.000000e+00> : vector<16x32xf32>
    %22 = tpu.matmul %21, %20, %cst_15 {dimension_numbers = #tpu.dot_dimension_numbers<[1], [0], [0], [1], [0, 0, 1, 1], [], []>} : vector<16x32xbf16>, vector<32x32xbf16>, vector<16x32xf32> -> vector<16x32xf32>
    %c0_16 = arith.constant 0 : index
    %c384_17 = arith.constant 384 : index
    %23 = vector.load %arg4[%c0_16, %c384_17] : memref<1x1408xf32, #tpu.memory_space<vmem>>, vector<1x32xf32>
    %24 = vector.broadcast %23 : vector<1x32xf32> to vector<16x32xf32>
    %25 = arith.addf %22, %24 : vector<16x32xf32>
    %26 = arith.truncf %25 : vector<16x32xf32> to vector<16x32xbf16>
    %cst_18 = arith.constant dense<0.000000e+00> : vector<16x32xf32>
    %27 = tpu.matmul %1, %26, %cst_18 {dimension_numbers = #tpu.dot_dimension_numbers<[1], [0], [0], [1], [0, 0, 1, 1], [], []>} : vector<16x16xbf16>, vector<16x32xbf16>, vector<16x32xf32> -> vector<16x32xf32>
    %c0_19 = arith.constant 0 : index
    %c512 = arith.constant 512 : index
    %28 = vector.load %arg3[%c0_19, %c512] : memref<32x1408xbf16, #tpu.memory_space<vmem>>, vector<32x96xbf16>
    %29 = arith.truncf %27 : vector<16x32xf32> to vector<16x32xbf16>
    %cst_20 = arith.constant dense<0.000000e+00> : vector<16x96xf32>
    %30 = tpu.matmul %29, %28, %cst_20 {dimension_numbers = #tpu.dot_dimension_numbers<[1], [0], [0], [1], [0, 0, 1, 1], [], []>} : vector<16x32xbf16>, vector<32x96xbf16>, vector<16x96xf32> -> vector<16x96xf32>
    %c0_21 = arith.constant 0 : index
    %c512_22 = arith.constant 512 : index
    %31 = vector.load %arg4[%c0_21, %c512_22] : memref<1x1408xf32, #tpu.memory_space<vmem>>, vector<1x96xf32>
    %32 = vector.broadcast %31 : vector<1x96xf32> to vector<16x96xf32>
    %33 = arith.addf %30, %32 : vector<16x96xf32>
    %34 = vector.extract_strided_slice %33 {offsets = [0, 0], sizes = [16, 32], strides = [1, 1]} : vector<16x96xf32> to vector<16x32xf32>
    %35 = vector.extract_strided_slice %19 {offsets = [0, 0], sizes = [16, 32], strides = [1, 1]} : vector<16x96xf32> to vector<16x32xf32>
    %36 = arith.addf %34, %35 : vector<16x32xf32>
    %cst_23 = arith.constant 0.000000e+00 : f32
    %37 = vector.broadcast %cst_23 : f32 to vector<16x32xf32>
    %38 = arith.subf %37, %36 : vector<16x32xf32>
    %39 = math.exp %38 : vector<16x32xf32>
    %cst_24 = arith.constant 1.000000e+00 : f32
    %40 = vector.broadcast %cst_24 : f32 to vector<16x32xf32>
    %41 = arith.addf %40, %39 : vector<16x32xf32>
    %cst_25 = arith.constant 1.000000e+00 : f32
    %42 = vector.broadcast %cst_25 : f32 to vector<16x32xf32>
    %43 = arith.divf %42, %41 : vector<16x32xf32>
    %44 = vector.extract_strided_slice %33 {offsets = [0, 32], sizes = [16, 32], strides = [1, 1]} : vector<16x96xf32> to vector<16x32xf32>
    %45 = vector.extract_strided_slice %19 {offsets = [0, 32], sizes = [16, 32], strides = [1, 1]} : vector<16x96xf32> to vector<16x32xf32>
    %46 = arith.addf %44, %45 : vector<16x32xf32>
    %cst_26 = arith.constant 0.000000e+00 : f32
    %47 = vector.broadcast %cst_26 : f32 to vector<16x32xf32>
    %48 = arith.subf %47, %46 : vector<16x32xf32>
    %49 = math.exp %48 : vector<16x32xf32>
    %cst_27 = arith.constant 1.000000e+00 : f32
    %50 = vector.broadcast %cst_27 : f32 to vector<16x32xf32>
    %51 = arith.addf %50, %49 : vector<16x32xf32>
    %cst_28 = arith.constant 1.000000e+00 : f32
    %52 = vector.broadcast %cst_28 : f32 to vector<16x32xf32>
    %53 = arith.divf %52, %51 : vector<16x32xf32>
    %54 = vector.extract_strided_slice %33 {offsets = [0, 64], sizes = [16, 32], strides = [1, 1]} : vector<16x96xf32> to vector<16x32xf32>
    %55 = vector.extract_strided_slice %19 {offsets = [0, 64], sizes = [16, 32], strides = [1, 1]} : vector<16x96xf32> to vector<16x32xf32>
    %56 = arith.mulf %43, %55 : vector<16x32xf32>
    %57 = arith.addf %54, %56 : vector<16x32xf32>
    %58 = math.tanh %57 : vector<16x32xf32>
    %cst_29 = arith.constant 1.000000e+00 : f32
    %59 = vector.broadcast %cst_29 : f32 to vector<16x32xf32>
    %60 = arith.subf %59, %53 : vector<16x32xf32>
    %61 = arith.mulf %60, %58 : vector<16x32xf32>
    %62 = arith.mulf %53, %9 : vector<16x32xf32>
    %63 = arith.addf %61, %62 : vector<16x32xf32>
    %c0_30 = arith.constant 0 : index
    %c640 = arith.constant 640 : index
    %64 = vector.load %arg3[%c0_30, %c640] : memref<32x1408xbf16, #tpu.memory_space<vmem>>, vector<32x256xbf16>
    %65 = arith.truncf %63 : vector<16x32xf32> to vector<16x32xbf16>
    %cst_31 = arith.constant dense<0.000000e+00> : vector<16x256xf32>
    %66 = tpu.matmul %65, %64, %cst_31 {dimension_numbers = #tpu.dot_dimension_numbers<[1], [0], [0], [1], [0, 0, 1, 1], [], []>} : vector<16x32xbf16>, vector<32x256xbf16>, vector<16x256xf32> -> vector<16x256xf32>
    %c0_32 = arith.constant 0 : index
    %c640_33 = arith.constant 640 : index
    %67 = vector.load %arg4[%c0_32, %c640_33] : memref<1x1408xf32, #tpu.memory_space<vmem>>, vector<1x256xf32>
    %68 = vector.broadcast %67 : vector<1x256xf32> to vector<16x256xf32>
    %69 = arith.addf %66, %68 : vector<16x256xf32>
    %70 = vector.extract_strided_slice %69 {offsets = [0, 0], sizes = [16, 32], strides = [1, 1]} : vector<16x256xf32> to vector<16x32xf32>
    %cst_34 = arith.constant 0.000000e+00 : f32
    %71 = vector.broadcast %cst_34 : f32 to vector<16x32xf32>
    %72 = arith.maximumf %70, %71 : vector<16x32xf32>
    %73 = vector.extract_strided_slice %69 {offsets = [0, 128], sizes = [16, 96], strides = [1, 1]} : vector<16x256xf32> to vector<16x96xf32>
    %c0_35 = arith.constant 0 : index
    %c896 = arith.constant 896 : index
    %74 = vector.load %arg3[%c0_35, %c896] : memref<32x1408xbf16, #tpu.memory_space<vmem>>, vector<32x32xbf16>
    %75 = arith.truncf %72 : vector<16x32xf32> to vector<16x32xbf16>
    %cst_36 = arith.constant dense<0.000000e+00> : vector<16x32xf32>
    %76 = tpu.matmul %75, %74, %cst_36 {dimension_numbers = #tpu.dot_dimension_numbers<[1], [0], [0], [1], [0, 0, 1, 1], [], []>} : vector<16x32xbf16>, vector<32x32xbf16>, vector<16x32xf32> -> vector<16x32xf32>
    %c0_37 = arith.constant 0 : index
    %c896_38 = arith.constant 896 : index
    %77 = vector.load %arg4[%c0_37, %c896_38] : memref<1x1408xf32, #tpu.memory_space<vmem>>, vector<1x32xf32>
    %78 = vector.broadcast %77 : vector<1x32xf32> to vector<16x32xf32>
    %79 = arith.addf %76, %78 : vector<16x32xf32>
    %80 = arith.truncf %79 : vector<16x32xf32> to vector<16x32xbf16>
    %cst_39 = arith.constant dense<0.000000e+00> : vector<16x32xf32>
    %81 = tpu.matmul %1, %80, %cst_39 {dimension_numbers = #tpu.dot_dimension_numbers<[0], [0], [1], [1], [0, 1, 1, 1], [], []>} : vector<16x16xbf16>, vector<16x32xbf16>, vector<16x32xf32> -> vector<16x32xf32>
    %c0_40 = arith.constant 0 : index
    %c1024 = arith.constant 1024 : index
    %82 = vector.load %arg3[%c0_40, %c1024] : memref<32x1408xbf16, #tpu.memory_space<vmem>>, vector<32x96xbf16>
    %83 = arith.truncf %81 : vector<16x32xf32> to vector<16x32xbf16>
    %cst_41 = arith.constant dense<0.000000e+00> : vector<16x96xf32>
    %84 = tpu.matmul %83, %82, %cst_41 {dimension_numbers = #tpu.dot_dimension_numbers<[1], [0], [0], [1], [0, 0, 1, 1], [], []>} : vector<16x32xbf16>, vector<32x96xbf16>, vector<16x96xf32> -> vector<16x96xf32>
    %c0_42 = arith.constant 0 : index
    %c1024_43 = arith.constant 1024 : index
    %85 = vector.load %arg4[%c0_42, %c1024_43] : memref<1x1408xf32, #tpu.memory_space<vmem>>, vector<1x96xf32>
    %86 = vector.broadcast %85 : vector<1x96xf32> to vector<16x96xf32>
    %87 = arith.addf %84, %86 : vector<16x96xf32>
    %88 = vector.extract_strided_slice %87 {offsets = [0, 0], sizes = [16, 32], strides = [1, 1]} : vector<16x96xf32> to vector<16x32xf32>
    %89 = vector.extract_strided_slice %73 {offsets = [0, 0], sizes = [16, 32], strides = [1, 1]} : vector<16x96xf32> to vector<16x32xf32>
    %90 = arith.addf %88, %89 : vector<16x32xf32>
    %cst_44 = arith.constant 0.000000e+00 : f32
    %91 = vector.broadcast %cst_44 : f32 to vector<16x32xf32>
    %92 = arith.subf %91, %90 : vector<16x32xf32>
    %93 = math.exp %92 : vector<16x32xf32>
    %cst_45 = arith.constant 1.000000e+00 : f32
    %94 = vector.broadcast %cst_45 : f32 to vector<16x32xf32>
    %95 = arith.addf %94, %93 : vector<16x32xf32>
    %cst_46 = arith.constant 1.000000e+00 : f32
    %96 = vector.broadcast %cst_46 : f32 to vector<16x32xf32>
    %97 = arith.divf %96, %95 : vector<16x32xf32>
    %98 = vector.extract_strided_slice %87 {offsets = [0, 32], sizes = [16, 32], strides = [1, 1]} : vector<16x96xf32> to vector<16x32xf32>
    %99 = vector.extract_strided_slice %73 {offsets = [0, 32], sizes = [16, 32], strides = [1, 1]} : vector<16x96xf32> to vector<16x32xf32>
    %100 = arith.addf %98, %99 : vector<16x32xf32>
    %cst_47 = arith.constant 0.000000e+00 : f32
    %101 = vector.broadcast %cst_47 : f32 to vector<16x32xf32>
    %102 = arith.subf %101, %100 : vector<16x32xf32>
    %103 = math.exp %102 : vector<16x32xf32>
    %cst_48 = arith.constant 1.000000e+00 : f32
    %104 = vector.broadcast %cst_48 : f32 to vector<16x32xf32>
    %105 = arith.addf %104, %103 : vector<16x32xf32>
    %cst_49 = arith.constant 1.000000e+00 : f32
    %106 = vector.broadcast %cst_49 : f32 to vector<16x32xf32>
    %107 = arith.divf %106, %105 : vector<16x32xf32>
    %108 = vector.extract_strided_slice %87 {offsets = [0, 64], sizes = [16, 32], strides = [1, 1]} : vector<16x96xf32> to vector<16x32xf32>
    %109 = vector.extract_strided_slice %73 {offsets = [0, 64], sizes = [16, 32], strides = [1, 1]} : vector<16x96xf32> to vector<16x32xf32>
    %110 = arith.mulf %97, %109 : vector<16x32xf32>
    %111 = arith.addf %108, %110 : vector<16x32xf32>
    %112 = math.tanh %111 : vector<16x32xf32>
    %cst_50 = arith.constant 1.000000e+00 : f32
    %113 = vector.broadcast %cst_50 : f32 to vector<16x32xf32>
    %114 = arith.subf %113, %107 : vector<16x32xf32>
    %115 = arith.mulf %114, %112 : vector<16x32xf32>
    %116 = arith.mulf %107, %63 : vector<16x32xf32>
    %117 = arith.addf %115, %116 : vector<16x32xf32>
    %c0_51 = arith.constant 0 : index
    %c128_52 = arith.constant 128 : index
    %118 = vector.load %arg3[%c0_51, %c128_52] : memref<32x1408xbf16, #tpu.memory_space<vmem>>, vector<32x256xbf16>
    %119 = arith.truncf %117 : vector<16x32xf32> to vector<16x32xbf16>
    %cst_53 = arith.constant dense<0.000000e+00> : vector<16x256xf32>
    %120 = tpu.matmul %119, %118, %cst_53 {dimension_numbers = #tpu.dot_dimension_numbers<[1], [0], [0], [1], [0, 0, 1, 1], [], []>} : vector<16x32xbf16>, vector<32x256xbf16>, vector<16x256xf32> -> vector<16x256xf32>
    %c0_54 = arith.constant 0 : index
    %c128_55 = arith.constant 128 : index
    %121 = vector.load %arg4[%c0_54, %c128_55] : memref<1x1408xf32, #tpu.memory_space<vmem>>, vector<1x256xf32>
    %122 = vector.broadcast %121 : vector<1x256xf32> to vector<16x256xf32>
    %123 = arith.addf %120, %122 : vector<16x256xf32>
    %124 = vector.extract_strided_slice %123 {offsets = [0, 0], sizes = [16, 32], strides = [1, 1]} : vector<16x256xf32> to vector<16x32xf32>
    %cst_56 = arith.constant 0.000000e+00 : f32
    %125 = vector.broadcast %cst_56 : f32 to vector<16x32xf32>
    %126 = arith.maximumf %124, %125 : vector<16x32xf32>
    %127 = vector.extract_strided_slice %123 {offsets = [0, 128], sizes = [16, 96], strides = [1, 1]} : vector<16x256xf32> to vector<16x96xf32>
    %c0_57 = arith.constant 0 : index
    %c384_58 = arith.constant 384 : index
    %128 = vector.load %arg3[%c0_57, %c384_58] : memref<32x1408xbf16, #tpu.memory_space<vmem>>, vector<32x32xbf16>
    %129 = arith.truncf %126 : vector<16x32xf32> to vector<16x32xbf16>
    %cst_59 = arith.constant dense<0.000000e+00> : vector<16x32xf32>
    %130 = tpu.matmul %129, %128, %cst_59 {dimension_numbers = #tpu.dot_dimension_numbers<[1], [0], [0], [1], [0, 0, 1, 1], [], []>} : vector<16x32xbf16>, vector<32x32xbf16>, vector<16x32xf32> -> vector<16x32xf32>
    %c0_60 = arith.constant 0 : index
    %c384_61 = arith.constant 384 : index
    %131 = vector.load %arg4[%c0_60, %c384_61] : memref<1x1408xf32, #tpu.memory_space<vmem>>, vector<1x32xf32>
    %132 = vector.broadcast %131 : vector<1x32xf32> to vector<16x32xf32>
    %133 = arith.addf %130, %132 : vector<16x32xf32>
    %134 = arith.truncf %133 : vector<16x32xf32> to vector<16x32xbf16>
    %cst_62 = arith.constant dense<0.000000e+00> : vector<16x32xf32>
    %135 = tpu.matmul %1, %134, %cst_62 {dimension_numbers = #tpu.dot_dimension_numbers<[1], [0], [0], [1], [0, 0, 1, 1], [], []>} : vector<16x16xbf16>, vector<16x32xbf16>, vector<16x32xf32> -> vector<16x32xf32>
    %c0_63 = arith.constant 0 : index
    %c512_64 = arith.constant 512 : index
    %136 = vector.load %arg3[%c0_63, %c512_64] : memref<32x1408xbf16, #tpu.memory_space<vmem>>, vector<32x96xbf16>
    %137 = arith.truncf %135 : vector<16x32xf32> to vector<16x32xbf16>
    %cst_65 = arith.constant dense<0.000000e+00> : vector<16x96xf32>
    %138 = tpu.matmul %137, %136, %cst_65 {dimension_numbers = #tpu.dot_dimension_numbers<[1], [0], [0], [1], [0, 0, 1, 1], [], []>} : vector<16x32xbf16>, vector<32x96xbf16>, vector<16x96xf32> -> vector<16x96xf32>
    %c0_66 = arith.constant 0 : index
    %c512_67 = arith.constant 512 : index
    %139 = vector.load %arg4[%c0_66, %c512_67] : memref<1x1408xf32, #tpu.memory_space<vmem>>, vector<1x96xf32>
    %140 = vector.broadcast %139 : vector<1x96xf32> to vector<16x96xf32>
    %141 = arith.addf %138, %140 : vector<16x96xf32>
    %142 = vector.extract_strided_slice %141 {offsets = [0, 0], sizes = [16, 32], strides = [1, 1]} : vector<16x96xf32> to vector<16x32xf32>
    %143 = vector.extract_strided_slice %127 {offsets = [0, 0], sizes = [16, 32], strides = [1, 1]} : vector<16x96xf32> to vector<16x32xf32>
    %144 = arith.addf %142, %143 : vector<16x32xf32>
    %cst_68 = arith.constant 0.000000e+00 : f32
    %145 = vector.broadcast %cst_68 : f32 to vector<16x32xf32>
    %146 = arith.subf %145, %144 : vector<16x32xf32>
    %147 = math.exp %146 : vector<16x32xf32>
    %cst_69 = arith.constant 1.000000e+00 : f32
    %148 = vector.broadcast %cst_69 : f32 to vector<16x32xf32>
    %149 = arith.addf %148, %147 : vector<16x32xf32>
    %cst_70 = arith.constant 1.000000e+00 : f32
    %150 = vector.broadcast %cst_70 : f32 to vector<16x32xf32>
    %151 = arith.divf %150, %149 : vector<16x32xf32>
    %152 = vector.extract_strided_slice %141 {offsets = [0, 32], sizes = [16, 32], strides = [1, 1]} : vector<16x96xf32> to vector<16x32xf32>
    %153 = vector.extract_strided_slice %127 {offsets = [0, 32], sizes = [16, 32], strides = [1, 1]} : vector<16x96xf32> to vector<16x32xf32>
    %154 = arith.addf %152, %153 : vector<16x32xf32>
    %cst_71 = arith.constant 0.000000e+00 : f32
    %155 = vector.broadcast %cst_71 : f32 to vector<16x32xf32>
    %156 = arith.subf %155, %154 : vector<16x32xf32>
    %157 = math.exp %156 : vector<16x32xf32>
    %cst_72 = arith.constant 1.000000e+00 : f32
    %158 = vector.broadcast %cst_72 : f32 to vector<16x32xf32>
    %159 = arith.addf %158, %157 : vector<16x32xf32>
    %cst_73 = arith.constant 1.000000e+00 : f32
    %160 = vector.broadcast %cst_73 : f32 to vector<16x32xf32>
    %161 = arith.divf %160, %159 : vector<16x32xf32>
    %162 = vector.extract_strided_slice %141 {offsets = [0, 64], sizes = [16, 32], strides = [1, 1]} : vector<16x96xf32> to vector<16x32xf32>
    %163 = vector.extract_strided_slice %127 {offsets = [0, 64], sizes = [16, 32], strides = [1, 1]} : vector<16x96xf32> to vector<16x32xf32>
    %164 = arith.mulf %151, %163 : vector<16x32xf32>
    %165 = arith.addf %162, %164 : vector<16x32xf32>
    %166 = math.tanh %165 : vector<16x32xf32>
    %cst_74 = arith.constant 1.000000e+00 : f32
    %167 = vector.broadcast %cst_74 : f32 to vector<16x32xf32>
    %168 = arith.subf %167, %161 : vector<16x32xf32>
    %169 = arith.mulf %168, %166 : vector<16x32xf32>
    %170 = arith.mulf %161, %117 : vector<16x32xf32>
    %171 = arith.addf %169, %170 : vector<16x32xf32>
    %c0_75 = arith.constant 0 : index
    %c640_76 = arith.constant 640 : index
    %172 = vector.load %arg3[%c0_75, %c640_76] : memref<32x1408xbf16, #tpu.memory_space<vmem>>, vector<32x256xbf16>
    %173 = arith.truncf %171 : vector<16x32xf32> to vector<16x32xbf16>
    %cst_77 = arith.constant dense<0.000000e+00> : vector<16x256xf32>
    %174 = tpu.matmul %173, %172, %cst_77 {dimension_numbers = #tpu.dot_dimension_numbers<[1], [0], [0], [1], [0, 0, 1, 1], [], []>} : vector<16x32xbf16>, vector<32x256xbf16>, vector<16x256xf32> -> vector<16x256xf32>
    %c0_78 = arith.constant 0 : index
    %c640_79 = arith.constant 640 : index
    %175 = vector.load %arg4[%c0_78, %c640_79] : memref<1x1408xf32, #tpu.memory_space<vmem>>, vector<1x256xf32>
    %176 = vector.broadcast %175 : vector<1x256xf32> to vector<16x256xf32>
    %177 = arith.addf %174, %176 : vector<16x256xf32>
    %178 = vector.extract_strided_slice %177 {offsets = [0, 0], sizes = [16, 32], strides = [1, 1]} : vector<16x256xf32> to vector<16x32xf32>
    %cst_80 = arith.constant 0.000000e+00 : f32
    %179 = vector.broadcast %cst_80 : f32 to vector<16x32xf32>
    %180 = arith.maximumf %178, %179 : vector<16x32xf32>
    %181 = vector.extract_strided_slice %177 {offsets = [0, 128], sizes = [16, 96], strides = [1, 1]} : vector<16x256xf32> to vector<16x96xf32>
    %c0_81 = arith.constant 0 : index
    %c896_82 = arith.constant 896 : index
    %182 = vector.load %arg3[%c0_81, %c896_82] : memref<32x1408xbf16, #tpu.memory_space<vmem>>, vector<32x32xbf16>
    %183 = arith.truncf %180 : vector<16x32xf32> to vector<16x32xbf16>
    %cst_83 = arith.constant dense<0.000000e+00> : vector<16x32xf32>
    %184 = tpu.matmul %183, %182, %cst_83 {dimension_numbers = #tpu.dot_dimension_numbers<[1], [0], [0], [1], [0, 0, 1, 1], [], []>} : vector<16x32xbf16>, vector<32x32xbf16>, vector<16x32xf32> -> vector<16x32xf32>
    %c0_84 = arith.constant 0 : index
    %c896_85 = arith.constant 896 : index
    %185 = vector.load %arg4[%c0_84, %c896_85] : memref<1x1408xf32, #tpu.memory_space<vmem>>, vector<1x32xf32>
    %186 = vector.broadcast %185 : vector<1x32xf32> to vector<16x32xf32>
    %187 = arith.addf %184, %186 : vector<16x32xf32>
    %188 = arith.truncf %187 : vector<16x32xf32> to vector<16x32xbf16>
    %cst_86 = arith.constant dense<0.000000e+00> : vector<16x32xf32>
    %189 = tpu.matmul %1, %188, %cst_86 {dimension_numbers = #tpu.dot_dimension_numbers<[0], [0], [1], [1], [0, 1, 1, 1], [], []>} : vector<16x16xbf16>, vector<16x32xbf16>, vector<16x32xf32> -> vector<16x32xf32>
    %c0_87 = arith.constant 0 : index
    %c1024_88 = arith.constant 1024 : index
    %190 = vector.load %arg3[%c0_87, %c1024_88] : memref<32x1408xbf16, #tpu.memory_space<vmem>>, vector<32x96xbf16>
    %191 = arith.truncf %189 : vector<16x32xf32> to vector<16x32xbf16>
    %cst_89 = arith.constant dense<0.000000e+00> : vector<16x96xf32>
    %192 = tpu.matmul %191, %190, %cst_89 {dimension_numbers = #tpu.dot_dimension_numbers<[1], [0], [0], [1], [0, 0, 1, 1], [], []>} : vector<16x32xbf16>, vector<32x96xbf16>, vector<16x96xf32> -> vector<16x96xf32>
    %c0_90 = arith.constant 0 : index
    %c1024_91 = arith.constant 1024 : index
    %193 = vector.load %arg4[%c0_90, %c1024_91] : memref<1x1408xf32, #tpu.memory_space<vmem>>, vector<1x96xf32>
    %194 = vector.broadcast %193 : vector<1x96xf32> to vector<16x96xf32>
    %195 = arith.addf %192, %194 : vector<16x96xf32>
    %196 = vector.extract_strided_slice %195 {offsets = [0, 0], sizes = [16, 32], strides = [1, 1]} : vector<16x96xf32> to vector<16x32xf32>
    %197 = vector.extract_strided_slice %181 {offsets = [0, 0], sizes = [16, 32], strides = [1, 1]} : vector<16x96xf32> to vector<16x32xf32>
    %198 = arith.addf %196, %197 : vector<16x32xf32>
    %cst_92 = arith.constant 0.000000e+00 : f32
    %199 = vector.broadcast %cst_92 : f32 to vector<16x32xf32>
    %200 = arith.subf %199, %198 : vector<16x32xf32>
    %201 = math.exp %200 : vector<16x32xf32>
    %cst_93 = arith.constant 1.000000e+00 : f32
    %202 = vector.broadcast %cst_93 : f32 to vector<16x32xf32>
    %203 = arith.addf %202, %201 : vector<16x32xf32>
    %cst_94 = arith.constant 1.000000e+00 : f32
    %204 = vector.broadcast %cst_94 : f32 to vector<16x32xf32>
    %205 = arith.divf %204, %203 : vector<16x32xf32>
    %206 = vector.extract_strided_slice %195 {offsets = [0, 32], sizes = [16, 32], strides = [1, 1]} : vector<16x96xf32> to vector<16x32xf32>
    %207 = vector.extract_strided_slice %181 {offsets = [0, 32], sizes = [16, 32], strides = [1, 1]} : vector<16x96xf32> to vector<16x32xf32>
    %208 = arith.addf %206, %207 : vector<16x32xf32>
    %cst_95 = arith.constant 0.000000e+00 : f32
    %209 = vector.broadcast %cst_95 : f32 to vector<16x32xf32>
    %210 = arith.subf %209, %208 : vector<16x32xf32>
    %211 = math.exp %210 : vector<16x32xf32>
    %cst_96 = arith.constant 1.000000e+00 : f32
    %212 = vector.broadcast %cst_96 : f32 to vector<16x32xf32>
    %213 = arith.addf %212, %211 : vector<16x32xf32>
    %cst_97 = arith.constant 1.000000e+00 : f32
    %214 = vector.broadcast %cst_97 : f32 to vector<16x32xf32>
    %215 = arith.divf %214, %213 : vector<16x32xf32>
    %216 = vector.extract_strided_slice %195 {offsets = [0, 64], sizes = [16, 32], strides = [1, 1]} : vector<16x96xf32> to vector<16x32xf32>
    %217 = vector.extract_strided_slice %181 {offsets = [0, 64], sizes = [16, 32], strides = [1, 1]} : vector<16x96xf32> to vector<16x32xf32>
    %218 = arith.mulf %205, %217 : vector<16x32xf32>
    %219 = arith.addf %216, %218 : vector<16x32xf32>
    %220 = math.tanh %219 : vector<16x32xf32>
    %cst_98 = arith.constant 1.000000e+00 : f32
    %221 = vector.broadcast %cst_98 : f32 to vector<16x32xf32>
    %222 = arith.subf %221, %215 : vector<16x32xf32>
    %223 = arith.mulf %222, %220 : vector<16x32xf32>
    %224 = arith.mulf %215, %171 : vector<16x32xf32>
    %225 = arith.addf %223, %224 : vector<16x32xf32>
    %c0_99 = arith.constant 0 : index
    %c128_100 = arith.constant 128 : index
    %226 = vector.load %arg3[%c0_99, %c128_100] : memref<32x1408xbf16, #tpu.memory_space<vmem>>, vector<32x256xbf16>
    %227 = arith.truncf %225 : vector<16x32xf32> to vector<16x32xbf16>
    %cst_101 = arith.constant dense<0.000000e+00> : vector<16x256xf32>
    %228 = tpu.matmul %227, %226, %cst_101 {dimension_numbers = #tpu.dot_dimension_numbers<[1], [0], [0], [1], [0, 0, 1, 1], [], []>} : vector<16x32xbf16>, vector<32x256xbf16>, vector<16x256xf32> -> vector<16x256xf32>
    %c0_102 = arith.constant 0 : index
    %c128_103 = arith.constant 128 : index
    %229 = vector.load %arg4[%c0_102, %c128_103] : memref<1x1408xf32, #tpu.memory_space<vmem>>, vector<1x256xf32>
    %230 = vector.broadcast %229 : vector<1x256xf32> to vector<16x256xf32>
    %231 = arith.addf %228, %230 : vector<16x256xf32>
    %232 = vector.extract_strided_slice %231 {offsets = [0, 0], sizes = [16, 32], strides = [1, 1]} : vector<16x256xf32> to vector<16x32xf32>
    %cst_104 = arith.constant 0.000000e+00 : f32
    %233 = vector.broadcast %cst_104 : f32 to vector<16x32xf32>
    %234 = arith.maximumf %232, %233 : vector<16x32xf32>
    %235 = vector.extract_strided_slice %231 {offsets = [0, 128], sizes = [16, 96], strides = [1, 1]} : vector<16x256xf32> to vector<16x96xf32>
    %c0_105 = arith.constant 0 : index
    %c384_106 = arith.constant 384 : index
    %236 = vector.load %arg3[%c0_105, %c384_106] : memref<32x1408xbf16, #tpu.memory_space<vmem>>, vector<32x32xbf16>
    %237 = arith.truncf %234 : vector<16x32xf32> to vector<16x32xbf16>
    %cst_107 = arith.constant dense<0.000000e+00> : vector<16x32xf32>
    %238 = tpu.matmul %237, %236, %cst_107 {dimension_numbers = #tpu.dot_dimension_numbers<[1], [0], [0], [1], [0, 0, 1, 1], [], []>} : vector<16x32xbf16>, vector<32x32xbf16>, vector<16x32xf32> -> vector<16x32xf32>
    %c0_108 = arith.constant 0 : index
    %c384_109 = arith.constant 384 : index
    %239 = vector.load %arg4[%c0_108, %c384_109] : memref<1x1408xf32, #tpu.memory_space<vmem>>, vector<1x32xf32>
    %240 = vector.broadcast %239 : vector<1x32xf32> to vector<16x32xf32>
    %241 = arith.addf %238, %240 : vector<16x32xf32>
    %242 = arith.truncf %241 : vector<16x32xf32> to vector<16x32xbf16>
    %cst_110 = arith.constant dense<0.000000e+00> : vector<16x32xf32>
    %243 = tpu.matmul %1, %242, %cst_110 {dimension_numbers = #tpu.dot_dimension_numbers<[1], [0], [0], [1], [0, 0, 1, 1], [], []>} : vector<16x16xbf16>, vector<16x32xbf16>, vector<16x32xf32> -> vector<16x32xf32>
    %c0_111 = arith.constant 0 : index
    %c512_112 = arith.constant 512 : index
    %244 = vector.load %arg3[%c0_111, %c512_112] : memref<32x1408xbf16, #tpu.memory_space<vmem>>, vector<32x96xbf16>
    %245 = arith.truncf %243 : vector<16x32xf32> to vector<16x32xbf16>
    %cst_113 = arith.constant dense<0.000000e+00> : vector<16x96xf32>
    %246 = tpu.matmul %245, %244, %cst_113 {dimension_numbers = #tpu.dot_dimension_numbers<[1], [0], [0], [1], [0, 0, 1, 1], [], []>} : vector<16x32xbf16>, vector<32x96xbf16>, vector<16x96xf32> -> vector<16x96xf32>
    %c0_114 = arith.constant 0 : index
    %c512_115 = arith.constant 512 : index
    %247 = vector.load %arg4[%c0_114, %c512_115] : memref<1x1408xf32, #tpu.memory_space<vmem>>, vector<1x96xf32>
    %248 = vector.broadcast %247 : vector<1x96xf32> to vector<16x96xf32>
    %249 = arith.addf %246, %248 : vector<16x96xf32>
    %250 = vector.extract_strided_slice %249 {offsets = [0, 0], sizes = [16, 32], strides = [1, 1]} : vector<16x96xf32> to vector<16x32xf32>
    %251 = vector.extract_strided_slice %235 {offsets = [0, 0], sizes = [16, 32], strides = [1, 1]} : vector<16x96xf32> to vector<16x32xf32>
    %252 = arith.addf %250, %251 : vector<16x32xf32>
    %cst_116 = arith.constant 0.000000e+00 : f32
    %253 = vector.broadcast %cst_116 : f32 to vector<16x32xf32>
    %254 = arith.subf %253, %252 : vector<16x32xf32>
    %255 = math.exp %254 : vector<16x32xf32>
    %cst_117 = arith.constant 1.000000e+00 : f32
    %256 = vector.broadcast %cst_117 : f32 to vector<16x32xf32>
    %257 = arith.addf %256, %255 : vector<16x32xf32>
    %cst_118 = arith.constant 1.000000e+00 : f32
    %258 = vector.broadcast %cst_118 : f32 to vector<16x32xf32>
    %259 = arith.divf %258, %257 : vector<16x32xf32>
    %260 = vector.extract_strided_slice %249 {offsets = [0, 32], sizes = [16, 32], strides = [1, 1]} : vector<16x96xf32> to vector<16x32xf32>
    %261 = vector.extract_strided_slice %235 {offsets = [0, 32], sizes = [16, 32], strides = [1, 1]} : vector<16x96xf32> to vector<16x32xf32>
    %262 = arith.addf %260, %261 : vector<16x32xf32>
    %cst_119 = arith.constant 0.000000e+00 : f32
    %263 = vector.broadcast %cst_119 : f32 to vector<16x32xf32>
    %264 = arith.subf %263, %262 : vector<16x32xf32>
    %265 = math.exp %264 : vector<16x32xf32>
    %cst_120 = arith.constant 1.000000e+00 : f32
    %266 = vector.broadcast %cst_120 : f32 to vector<16x32xf32>
    %267 = arith.addf %266, %265 : vector<16x32xf32>
    %cst_121 = arith.constant 1.000000e+00 : f32
    %268 = vector.broadcast %cst_121 : f32 to vector<16x32xf32>
    %269 = arith.divf %268, %267 : vector<16x32xf32>
    %270 = vector.extract_strided_slice %249 {offsets = [0, 64], sizes = [16, 32], strides = [1, 1]} : vector<16x96xf32> to vector<16x32xf32>
    %271 = vector.extract_strided_slice %235 {offsets = [0, 64], sizes = [16, 32], strides = [1, 1]} : vector<16x96xf32> to vector<16x32xf32>
    %272 = arith.mulf %259, %271 : vector<16x32xf32>
    %273 = arith.addf %270, %272 : vector<16x32xf32>
    %274 = math.tanh %273 : vector<16x32xf32>
    %cst_122 = arith.constant 1.000000e+00 : f32
    %275 = vector.broadcast %cst_122 : f32 to vector<16x32xf32>
    %276 = arith.subf %275, %269 : vector<16x32xf32>
    %277 = arith.mulf %276, %274 : vector<16x32xf32>
    %278 = arith.mulf %269, %225 : vector<16x32xf32>
    %279 = arith.addf %277, %278 : vector<16x32xf32>
    %c0_123 = arith.constant 0 : index
    %c640_124 = arith.constant 640 : index
    %280 = vector.load %arg3[%c0_123, %c640_124] : memref<32x1408xbf16, #tpu.memory_space<vmem>>, vector<32x256xbf16>
    %281 = arith.truncf %279 : vector<16x32xf32> to vector<16x32xbf16>
    %cst_125 = arith.constant dense<0.000000e+00> : vector<16x256xf32>
    %282 = tpu.matmul %281, %280, %cst_125 {dimension_numbers = #tpu.dot_dimension_numbers<[1], [0], [0], [1], [0, 0, 1, 1], [], []>} : vector<16x32xbf16>, vector<32x256xbf16>, vector<16x256xf32> -> vector<16x256xf32>
    %c0_126 = arith.constant 0 : index
    %c640_127 = arith.constant 640 : index
    %283 = vector.load %arg4[%c0_126, %c640_127] : memref<1x1408xf32, #tpu.memory_space<vmem>>, vector<1x256xf32>
    %284 = vector.broadcast %283 : vector<1x256xf32> to vector<16x256xf32>
    %285 = arith.addf %282, %284 : vector<16x256xf32>
    %286 = vector.extract_strided_slice %285 {offsets = [0, 0], sizes = [16, 32], strides = [1, 1]} : vector<16x256xf32> to vector<16x32xf32>
    %cst_128 = arith.constant 0.000000e+00 : f32
    %287 = vector.broadcast %cst_128 : f32 to vector<16x32xf32>
    %288 = arith.maximumf %286, %287 : vector<16x32xf32>
    %289 = vector.extract_strided_slice %285 {offsets = [0, 128], sizes = [16, 96], strides = [1, 1]} : vector<16x256xf32> to vector<16x96xf32>
    %c0_129 = arith.constant 0 : index
    %c896_130 = arith.constant 896 : index
    %290 = vector.load %arg3[%c0_129, %c896_130] : memref<32x1408xbf16, #tpu.memory_space<vmem>>, vector<32x32xbf16>
    %291 = arith.truncf %288 : vector<16x32xf32> to vector<16x32xbf16>
    %cst_131 = arith.constant dense<0.000000e+00> : vector<16x32xf32>
    %292 = tpu.matmul %291, %290, %cst_131 {dimension_numbers = #tpu.dot_dimension_numbers<[1], [0], [0], [1], [0, 0, 1, 1], [], []>} : vector<16x32xbf16>, vector<32x32xbf16>, vector<16x32xf32> -> vector<16x32xf32>
    %c0_132 = arith.constant 0 : index
    %c896_133 = arith.constant 896 : index
    %293 = vector.load %arg4[%c0_132, %c896_133] : memref<1x1408xf32, #tpu.memory_space<vmem>>, vector<1x32xf32>
    %294 = vector.broadcast %293 : vector<1x32xf32> to vector<16x32xf32>
    %295 = arith.addf %292, %294 : vector<16x32xf32>
    %296 = arith.truncf %295 : vector<16x32xf32> to vector<16x32xbf16>
    %cst_134 = arith.constant dense<0.000000e+00> : vector<16x32xf32>
    %297 = tpu.matmul %1, %296, %cst_134 {dimension_numbers = #tpu.dot_dimension_numbers<[0], [0], [1], [1], [0, 1, 1, 1], [], []>} : vector<16x16xbf16>, vector<16x32xbf16>, vector<16x32xf32> -> vector<16x32xf32>
    %c0_135 = arith.constant 0 : index
    %c1024_136 = arith.constant 1024 : index
    %298 = vector.load %arg3[%c0_135, %c1024_136] : memref<32x1408xbf16, #tpu.memory_space<vmem>>, vector<32x96xbf16>
    %299 = arith.truncf %297 : vector<16x32xf32> to vector<16x32xbf16>
    %cst_137 = arith.constant dense<0.000000e+00> : vector<16x96xf32>
    %300 = tpu.matmul %299, %298, %cst_137 {dimension_numbers = #tpu.dot_dimension_numbers<[1], [0], [0], [1], [0, 0, 1, 1], [], []>} : vector<16x32xbf16>, vector<32x96xbf16>, vector<16x96xf32> -> vector<16x96xf32>
    %c0_138 = arith.constant 0 : index
    %c1024_139 = arith.constant 1024 : index
    %301 = vector.load %arg4[%c0_138, %c1024_139] : memref<1x1408xf32, #tpu.memory_space<vmem>>, vector<1x96xf32>
    %302 = vector.broadcast %301 : vector<1x96xf32> to vector<16x96xf32>
    %303 = arith.addf %300, %302 : vector<16x96xf32>
    %304 = vector.extract_strided_slice %303 {offsets = [0, 0], sizes = [16, 32], strides = [1, 1]} : vector<16x96xf32> to vector<16x32xf32>
    %305 = vector.extract_strided_slice %289 {offsets = [0, 0], sizes = [16, 32], strides = [1, 1]} : vector<16x96xf32> to vector<16x32xf32>
    %306 = arith.addf %304, %305 : vector<16x32xf32>
    %cst_140 = arith.constant 0.000000e+00 : f32
    %307 = vector.broadcast %cst_140 : f32 to vector<16x32xf32>
    %308 = arith.subf %307, %306 : vector<16x32xf32>
    %309 = math.exp %308 : vector<16x32xf32>
    %cst_141 = arith.constant 1.000000e+00 : f32
    %310 = vector.broadcast %cst_141 : f32 to vector<16x32xf32>
    %311 = arith.addf %310, %309 : vector<16x32xf32>
    %cst_142 = arith.constant 1.000000e+00 : f32
    %312 = vector.broadcast %cst_142 : f32 to vector<16x32xf32>
    %313 = arith.divf %312, %311 : vector<16x32xf32>
    %314 = vector.extract_strided_slice %303 {offsets = [0, 32], sizes = [16, 32], strides = [1, 1]} : vector<16x96xf32> to vector<16x32xf32>
    %315 = vector.extract_strided_slice %289 {offsets = [0, 32], sizes = [16, 32], strides = [1, 1]} : vector<16x96xf32> to vector<16x32xf32>
    %316 = arith.addf %314, %315 : vector<16x32xf32>
    %cst_143 = arith.constant 0.000000e+00 : f32
    %317 = vector.broadcast %cst_143 : f32 to vector<16x32xf32>
    %318 = arith.subf %317, %316 : vector<16x32xf32>
    %319 = math.exp %318 : vector<16x32xf32>
    %cst_144 = arith.constant 1.000000e+00 : f32
    %320 = vector.broadcast %cst_144 : f32 to vector<16x32xf32>
    %321 = arith.addf %320, %319 : vector<16x32xf32>
    %cst_145 = arith.constant 1.000000e+00 : f32
    %322 = vector.broadcast %cst_145 : f32 to vector<16x32xf32>
    %323 = arith.divf %322, %321 : vector<16x32xf32>
    %324 = vector.extract_strided_slice %303 {offsets = [0, 64], sizes = [16, 32], strides = [1, 1]} : vector<16x96xf32> to vector<16x32xf32>
    %325 = vector.extract_strided_slice %289 {offsets = [0, 64], sizes = [16, 32], strides = [1, 1]} : vector<16x96xf32> to vector<16x32xf32>
    %326 = arith.mulf %313, %325 : vector<16x32xf32>
    %327 = arith.addf %324, %326 : vector<16x32xf32>
    %328 = math.tanh %327 : vector<16x32xf32>
    %cst_146 = arith.constant 1.000000e+00 : f32
    %329 = vector.broadcast %cst_146 : f32 to vector<16x32xf32>
    %330 = arith.subf %329, %323 : vector<16x32xf32>
    %331 = arith.mulf %330, %328 : vector<16x32xf32>
    %332 = arith.mulf %323, %279 : vector<16x32xf32>
    %333 = arith.addf %331, %332 : vector<16x32xf32>
    %c0_147 = arith.constant 0 : index
    %c1152 = arith.constant 1152 : index
    %334 = vector.load %arg3[%c0_147, %c1152] : memref<32x1408xbf16, #tpu.memory_space<vmem>>, vector<32x32xbf16>
    %335 = arith.truncf %333 : vector<16x32xf32> to vector<16x32xbf16>
    %cst_148 = arith.constant dense<0.000000e+00> : vector<16x32xf32>
    %336 = tpu.matmul %335, %334, %cst_148 {dimension_numbers = #tpu.dot_dimension_numbers<[1], [0], [0], [1], [0, 0, 1, 1], [], []>} : vector<16x32xbf16>, vector<32x32xbf16>, vector<16x32xf32> -> vector<16x32xf32>
    %c0_149 = arith.constant 0 : index
    %c1152_150 = arith.constant 1152 : index
    %337 = vector.load %arg4[%c0_149, %c1152_150] : memref<1x1408xf32, #tpu.memory_space<vmem>>, vector<1x32xf32>
    %338 = vector.broadcast %337 : vector<1x32xf32> to vector<16x32xf32>
    %339 = arith.addf %336, %338 : vector<16x32xf32>
    %cst_151 = arith.constant 0.000000e+00 : f32
    %340 = vector.broadcast %cst_151 : f32 to vector<16x32xf32>
    %341 = arith.maximumf %339, %340 : vector<16x32xf32>
    %c0_152 = arith.constant 0 : index
    %c1280 = arith.constant 1280 : index
    %342 = vector.load %arg3[%c0_152, %c1280] : memref<32x1408xbf16, #tpu.memory_space<vmem>>, vector<32x128xbf16>
    %343 = arith.truncf %341 : vector<16x32xf32> to vector<16x32xbf16>
    %cst_153 = arith.constant dense<0.000000e+00> : vector<16x128xf32>
    %344 = tpu.matmul %343, %342, %cst_153 {dimension_numbers = #tpu.dot_dimension_numbers<[1], [0], [0], [1], [0, 0, 1, 1], [], []>} : vector<16x32xbf16>, vector<32x128xbf16>, vector<16x128xf32> -> vector<16x128xf32>
    %c0_154 = arith.constant 0 : index
    %c1280_155 = arith.constant 1280 : index
    %345 = vector.load %arg4[%c0_154, %c1280_155] : memref<1x1408xf32, #tpu.memory_space<vmem>>, vector<1x128xf32>
    %346 = vector.broadcast %345 : vector<1x128xf32> to vector<16x128xf32>
    %347 = arith.addf %344, %346 : vector<16x128xf32>
    %c0_156 = arith.constant 0 : index
    %c0_157 = arith.constant 0 : index
    %c0_158 = arith.constant 0 : index
    %348 = vector.load %arg5[%c0_156, %c0_157, %c0_158] : memref<1x16x128xf32, #tpu.memory_space<vmem>>, vector<1x16x128xf32>
    %349 = vector.shape_cast %348 : vector<1x16x128xf32> to vector<16x128xf32>
    %350 = vector.shape_cast %347 : vector<16x128xf32> to vector<1x16x128xf32>
    tpu.vector_store %arg5[%c0_156, %c0_157, %c0_158], %350 {strides = array<i32>} : memref<1x16x128xf32, #tpu.memory_space<vmem>>, vector<1x16x128xf32>,
    return
  }
  func.func @transform_0(%arg0: i32) -> (i32, i32, i32) {
    %c0_i32 = arith.constant 0 : i32
    %c0_i32_0 = arith.constant 0 : i32
    %c0_i32_1 = arith.constant 0 : i32
    return %arg0, %c0_i32, %c0_i32_0 : i32, i32, i32
  }
  func.func @transform_1(%arg0: i32) -> (i32, i32, i32) {
    %c0_i32 = arith.constant 0 : i32
    %c0_i32_0 = arith.constant 0 : i32
    %c0_i32_1 = arith.constant 0 : i32
    return %arg0, %c0_i32, %c0_i32_0 : i32, i32, i32
  }
  func.func @transform_2(%arg0: i32) -> (i32, i32) {
    %c0_i32 = arith.constant 0 : i32
    %c0_i32_0 = arith.constant 0 : i32
    %c0_i32_1 = arith.constant 0 : i32
    return %c0_i32, %c0_i32_0 : i32, i32
  }
  func.func @transform_3(%arg0: i32) -> (i32, i32) {
    %c0_i32 = arith.constant 0 : i32
    %c0_i32_0 = arith.constant 0 : i32
    %c0_i32_1 = arith.constant 0 : i32
    return %c0_i32, %c0_i32_0 : i32, i32
  }
  func.func @transform_4(%arg0: i32) -> (i32, i32, i32) {
    %c0_i32 = arith.constant 0 : i32
    %c0_i32_0 = arith.constant 0 : i32
    %c0_i32_1 = arith.constant 0 : i32
    return %arg0, %c0_i32, %c0_i32_0 : i32, i32, i32
  }
}

</mosaic_0001>

<bundles_post_ra>
// kernel: tpu_custom_call.1
= control target key start
LH: loop header
LB: loop body
LE: loop exit
PB: predicated region body
PF: predicated region fallthrough
CT: control target
= control target key end

     0   :  { %s3572_s0 = inlined_call_operand.hbm [shape: f32[2,16,32], index: 0, kind: input, shape index: {}]   ;;  %s3573_s1 = inlined_call_operand.hbm [shape: bf16[2,16,16], index: 1, kind: input, shape index: {}]   ;;  %s3574_s2 = inlined_call_operand.hbm [shape: bf16[32,1408], index: 2, kind: input, shape index: {}]   ;;  %s3575_s3 = inlined_call_operand.hbm [shape: f32[1,1408], index: 3, kind: input, shape index: {}]   ;;  %s3576_s4 = inlined_call_operand.hbm [shape: f32[2,16,128], index: 4, kind: output, shape index: {}]  }
   0x1   :  { %3580 = sst [smem:[#allocation16_spill]] %s3572_s0 }
   0x2   :  { %3581 = sst [smem:[#allocation17_spill]] %s3574_s2 }
   0x3   :  { %9 = vsyncpa [#allocation3], 0 }
   0x4   :  { %11 = vsyncpa [#allocation3 + $0x1], 0 }
   0x5   :  { %12 = vsyncpa [#allocation6], 0 }
   0x6   :  { %14 = vsyncpa [#allocation6 + $0x1], 0 }
   0x7   :  { %15 = vsyncpa [#allocation9], 0 }
   0x8   :  { %16 = vsyncpa [#allocation4], 0 }
   0x9   :  { %18 = vsyncpa [#allocation4 + $0x1], 0  ;;  %s2953_s15 = smov 0   ;;  %s2955_s16 = smov 0  }
   0xa   :  { %s2957_s17 = smov 0   ;;  %s2959_s18 = smov 0  }
   0xb LB: > { %s2974_s19 = sadd.s32 4294967295, %s2907_s18   ;;  %s2243_s20 = sadd.s32 4294967294, %s2907_s18   ;;  %s2907_s18 = sphi %s2959_s18, %s3602_s18   ;;  %s2903_s17 = sphi %s2957_s17, %s3601_s17   ;;  %s2899_s16 = sphi %s2955_s16, %s3600_s16   ;;  %s2895_s15 = sphi %s2953_s15, %s3599_s15  }
   0xc   : > { %p44_p0 = scmp.ne.s32.totalorder %s2899_s16, %s2895_s15  ;;  %p3577_p1 = scmp.eq.s32.totalorder %s2974_s19, 0 }
   0xd   : > { %p142_p3 = scmp.eq.s32.totalorder %s2243_s20, 1  ;;  %p2244_p5 = scmp.ge.s32.totalorder %s2907_s18, 1 }
   0xe   : > { %p2983_p4 = por %p3577_p1, %p44_p0  ;;  %p149_p7 = scmp.lt.s32.totalorder %s2907_s18, 3 }
   0xf   : > { %p2988_p6 = por %p142_p3, %p44_p0  ;;  %s2909_s24 = smov [#allocation7]  }
  0x10   : > { %s3582_s21 = scalar_select %p2983_p4, 1, 0 }
  0x11   : > { %s3583_s22 = scalar_select %p2988_p6, 1, 0 }
  0x12   : > { %p2993_p8 = pnand %p2244_p5, %p149_p7  ;;  %s161_s25 = sshll.u32 %s2909_s24, 4  ;;  %s162_s25 = int_to_ptr.vmem [resolvable:$true] %s161_s25 }
  0x13   : > { %s2910_s27 = smov [#allocation8]   ;;  %s2734_s29 = scalar_lea.vmem %s162_s25, 2816 }
  0x14   : > { %p2552_p9 = pneg %p2993_p8  ;;  %s175_s28 = sshll.u32 %s2910_s27, 4  ;;  %s176_s28 = int_to_ptr.vmem [resolvable:$true] %s175_s28 }
  0x15   : > { %p2735_p13 = scmp.ne.s32.totalorder %s162_s25, %s2734_s29  ;;  %p2742_p5 = scmp.lt.s32.totalorder %s162_s25, %s162_s25 }
  0x16   : > { %p3002_p11 = pnand %p2552_p9, %p3577_p1  ;;  %p2743_p7 = scmp.lt.s32.totalorder %s2734_s29, %s2734_s29 }
  0x18   : > { %p2725_p12 = pneg %p3002_p11  ;;  %p2744_p10 = por %p2743_p7, %p2742_p5 }
  0x1a   : > { %p2737_p0 = pnand %p2735_p13, %p2725_p12 }
  0x1c   : > { %p2738_p3 = pneg %p2737_p0 }
  0x1e   : > { %p2745_p9 = pnand %p2744_p10, %p2738_p3 }
  0x20   : > { %2748 = shalt.err (!%p2745_p9)
}
  0x21   : > { %s2911_s30 = smov 704   ;;  %s2912_s5 = smov 44  }
  0x22   : > { %s3586_s2 = sld [smem:[#allocation17_spill]]  ;;  %s2760_s8 = scalar_lea.vmem %s176_s28, 176 }
  0x23   : > { %p2761_p1 = scmp.ne.s32.totalorder %s176_s28, %s2760_s8  ;;  %s2767_s9 = scalar_lea.vmem %s176_s28, 192 }
  0x24   : > { %p2768_p2 = scmp.lt.s32.totalorder %s176_s28, %s176_s28  ;;  %p2769_p5 = scmp.lt.s32.totalorder %s2767_s9, %s2760_s8 }
  0x25   : > { %p2763_p13 = pnand %p2761_p1, %p2725_p12 }
  0x26   : > { %p2770_p10 = por %p2769_p5, %p2768_p2 }
  0x27   : > { %p2764_p0 = pneg %p2763_p13 }
  0x28   : > { %2555 = dma.hbm_to_vmem [thread:$0]  (!%p3002_p11), %s3586_s2, 2816, %s162_s25, [#allocation6], %s2911_s30, %s2911_s30, %s2912_s5  }
  0x29   : > { %p2771_p3 = pnand %p2770_p10, %p2764_p0 }
  0x2b   : > { %2774 = shalt.err (!%p2771_p3)
}
  0x2c   : > { %2558 = dma.hbm_to_vmem [thread:$0]  (!%p3002_p11), %s3575_s3, 176, %s176_s28, [#allocation9]  }
  0x2d   : > { %s3025_s12 = sadd.s32 1, %s2907_s18   ;;  %s31_s13 = sadd.s32 1, %s2903_s17 }
  0x2e   : > { %s28_s14 = ssub.s32 %s2907_s18, %s3025_s12  ;;  %p38_p1 = scmp.ne.s32.totalorder %s2903_s17, %s2899_s16 }
  0x2f   : > { %p29_p2 = scmp.eq.s32.totalorder %s28_s14, 0  ;;  %p39_p12 = scmp.eq.s32.totalorder %s2907_s18, 0 }
  0x30   : > { %p3587_p7 = scmp.eq.s32.totalorder %s2974_s19, 1  ;;  %p2572_p13 = scmp.lt.s32.totalorder %s2907_s18, 2 }
  0x31   : > { %s3041_s24 = scalar_select %p29_p2, %s2903_s17, %s31_s13  }
  0x32   : > { %p3035_p9 = por %p3587_p7, %p38_p1  ;;  %p40_p0 = por %p39_p12, %p38_p1 }
  0x33   : > { %s3044_s25 = sand.u32 1, %s2903_s17   ;;  %s2322_s27 = sshll.u32 %s2907_s18, 8 }
  0x34   : > { %s3588_s20 = scalar_select %p3035_p9, 1, 0 }
  0x35   : > { %s2248_s26 = sshll.u32 %s3044_s25, 4  ;;  %s3589_s0 = sld [smem:[#allocation16_spill]] }
  0x36   : > { %s190_s5 = scalar_lea.vmem [#allocation2], %s2248_s26  ;;  %p3055_p11 = pnand %p2572_p13, %p40_p0 }
  0x37   : > { %s197_s6 = sshll.u32 %s190_s5, 4  ;;  %s207_s8 = sand.u32 1, %s2907_s18   ;;  %s3053_s6 = int_to_ptr.vmem [resolvable:$true] %s197_s6 }
  0x38   : > { %s187_s9 = scalar_lea.sflag [#allocation3], %s3044_s25  ;;  %p2777_p10 = pneg %p3055_p11 }
  0x3b   : > { %s3051_s30 = scalar_lea.hbm %s3589_s0, %s2322_s27  ;;  %s2780_s14 = scalar_lea.hbm %s3589_s0, 512 }
  0x3c   : > { %s2775_s10 = scalar_lea.hbm %s3051_s30, 256  ;;  %p2781_p2 = scmp.lt.s32.totalorder %s3051_s30, %s3589_s0 }
  0x3d   : > { %p2776_p5 = scmp.ne.s32.totalorder %s3051_s30, %s2775_s10  ;;  %p2782_p12 = scmp.lt.s32.totalorder %s2780_s14, %s2775_s10 }
  0x3f   : > { %p2778_p3 = pnand %p2777_p10, %p2776_p5  ;;  %p2783_p7 = por %p2782_p12, %p2781_p2 }
  0x41   : > { %p2779_p1 = pneg %p2778_p3 }
  0x43   : > { %p2784_p13 = pnand %p2783_p7, %p2779_p1 }
  0x45   : > { %2787 = shalt.err (!%p2784_p13)
}
  0x46   : > { %s2788_s28 = scalar_lea.vmem %s3053_s6, 256  ;;  %s2913_s29 = smov [#allocation2]  }
  0x47   : > { %p2789_p0 = scmp.ne.s32.totalorder %s3053_s6, %s2788_s28  ;;  %s2793_s5 = sshll.u32 %s2913_s29, 4  ;;  %s2794_s5 = int_to_ptr.vmem [resolvable:$false] %s2793_s5 }
  0x48   : > { %s2795_s11 = scalar_lea.vmem %s2794_s5, 512  ;;  %p2796_p6 = scmp.lt.s32.totalorder %s3053_s6, %s2794_s5 }
  0x49   : > { %p2791_p5 = pnand %p2789_p0, %p2777_p10  ;;  %p2797_p9 = scmp.lt.s32.totalorder %s2795_s11, %s2788_s28 }
  0x4b   : > { %p2792_p3 = pneg %p2791_p5  ;;  %p2798_p4 = por %p2797_p9, %p2796_p6 }
  0x4d   : > { %p2799_p2 = pnand %p2798_p4, %p2792_p3 }
  0x4f   : > { %2802 = shalt.err (!%p2799_p2)
}
  0x50   : > { %s2914_s10 = smov 128   ;;  %s2915_s13 = smov 8  }
  0x51   : > { %2562 = dma.hbm_to_vmem [thread:$0]  (!%p3055_p11), %s3051_s30, 256, %s3053_s6, %s187_s9, %s2914_s10, %s2914_s10, %s2915_s13  }
  0x52   : > { %s2251_s14 = sshll.u32 %s3044_s25, 3  ;;  %s2323_s26 = sshll.u32 %s2907_s18, 7 }
  0x53   : > { %s3092_s29 = scalar_lea.hbm %s3573_s1, %s2323_s26  ;;  %s211_s5 = scalar_lea.vmem [#allocation5], %s2251_s14 }
  0x54   : > { %s218_s11 = sshll.u32 %s211_s5, 4  ;;  %s3098_s0 = scalar_lea.sflag [#allocation6], %s207_s8  ;;  %s3094_s11 = int_to_ptr.vmem [resolvable:$true] %s218_s11 }
  0x55   : > { %s2803_s2 = scalar_lea.hbm %s3092_s29, 128  ;;  %s2808_s6 = scalar_lea.hbm %s3573_s1, 256 }
  0x56   : > { %p2804_p4 = scmp.ne.s32.totalorder %s3092_s29, %s2803_s2  ;;  %p2809_p1 = scmp.lt.s32.totalorder %s3092_s29, %s3573_s1 }
  0x57   : > { %p2810_p12 = scmp.lt.s32.totalorder %s2808_s6, %s2803_s2 }
  0x58   : > { %p2806_p6 = pnand %p2804_p4, %p2777_p10 }
  0x59   : > { %p2811_p7 = por %p2810_p12, %p2809_p1 }
  0x5a   : > { %p2807_p9 = pneg %p2806_p6 }
  0x5c   : > { %p2812_p13 = pnand %p2811_p7, %p2807_p9 }
  0x5e   : > { %2815 = shalt.err (!%p2812_p13)
}
  0x5f   : > { %s2816_s8 = scalar_lea.vmem %s3094_s11, 128  ;;  %s2916_s13 = smov [#allocation5]  }
  0x60   : > { %p2817_p0 = scmp.ne.s32.totalorder %s3094_s11, %s2816_s8  ;;  %s2821_s14 = sshll.u32 %s2916_s13, 4  ;;  %s2822_s14 = int_to_ptr.vmem [resolvable:$false] %s2821_s14 }
  0x61   : > { %s2823_s26 = scalar_lea.vmem %s2822_s14, 256  ;;  %p2824_p2 = scmp.lt.s32.totalorder %s3094_s11, %s2822_s14 }
  0x62   : > { %p2819_p5 = pnand %p2817_p0, %p2777_p10  ;;  %p2825_p4 = scmp.lt.s32.totalorder %s2823_s26, %s2816_s8 }
  0x64   : > { %p2820_p3 = pneg %p2819_p5  ;;  %p2826_p6 = por %p2825_p4, %p2824_p2 }
  0x66   : > { %p2827_p1 = pnand %p2826_p6, %p2820_p3 }
  0x68   : > { %2830 = shalt.err (!%p2827_p1)
}
  0x69   : > { %s2917_s2 = smov 64   ;;  %s2918_s27 = smov 4  }
  0x6a   : > { %2565 = dma.hbm_to_vmem [thread:$0]  (!%p3055_p11), %s3092_s29, 128, %s3094_s11, %s3098_s0, %s2917_s2, %s2917_s2, %s2918_s27  }
  0x6b   : > { %230 = sbr.rel (%p2993_p8) target bundleno = 8012 (0x1f4c), region = 36  ;;  %s3126_s28 = sand.u32 (!%p2993_p8), 1, %s2899_s16  }
  0x6c   : > { %s2255_s5 = sshll.u32 (!%p2993_p8), %s3126_s28, 4  ;;  %s233_s25 = scalar_lea.sflag (!%p2993_p8), [#allocation3], %s3126_s28 }
  0x6d   : > { %s236_s30 = scalar_lea.vmem (!%p2993_p8), [#allocation2], %s2255_s5  ;;  %p3591_p10 = scmp.ne.s32.totalorder (!%p2993_p8), %s3582_s21, 0 }
  0x70   : > { %2874 = dma.done.wait (%p3591_p10), %s233_s25, 256  }
  0x71   : > { %2876 = vsyncadd (%p3591_p10), %s233_s25, 4294967040  ;;  %s241_s0 = sand.u32 1, %s2974_s19   ;;  %s2256_s23 = sshll.u32 %s3126_s28, 3 }
  0x72   : > { %s242_s7 = scalar_lea.sflag [#allocation6], %s241_s0  ;;  %s3138_s29 = scalar_lea.vmem [#allocation5], %s2256_s23 }
  0x73   : > { %2878 = dma.done.wait (%p3591_p10), %s242_s7, 128  }
  0x74   : > { %2880 = vsyncadd (%p3591_p10), %s242_s7, 4294967168  ;;  %p3592_p8 = scmp.eq.s32.totalorder %s2974_s19, 0 }
  0x76   : > { %2882 = dma.done.wait (%p3592_p8), [#allocation6], 2816   ;;  %p3593_p11 = pmov %p3592_p8 }
  0x77   : > { %p3594_p9 = pmov %p3592_p8 }
  0x78   : > { %2884 = vsyncadd (%p3593_p11), [#allocation6], 4294964480 }
  0x79   : > { %2886 = dma.done.wait (%p3594_p9), [#allocation9], 176   ;;  %p3595_p12 = pmov %p3592_p8 }
  0x7a   : > { %v2919_v0 = vmov 0.0   ;;  %vm2920_vm0 = vmmov 0   ;;  %v2624_v1 = vld [vmem:[#allocation7 + $0x58] ss:$44 sps:$4 sm:$0xff]   ;;  %v2625_v2 = vld [vmem:[#allocation7] ss:$44 sps:$4 sm:$0xff]   ;;  %v364_v21 = vlaneseq }
  0x7b   : > { %2888 = vsyncadd (%p3595_p12), [#allocation9], 4294967120  ;;  %2382 = vmatprep.subr.bf16.mxu0 %v2919_v0  ;;  %2386 = vmatprep.mubr.msk.bf16.mxu0 %vm2920_vm0, %v2919_v0  ;;  %v286_v3 = vld [vmem:[%s236_s30] sm:$0xff]  ;;  %v287_v4 = vld [vmem:[%s236_s30 + $0x8] sm:$0xff]  ;;  %vm312_vm1 = vcmask 261120   ;;  %v2921_v10 = vmov 0  }
  0x7c   : > { %2383 = vmatpush3.bf16.msra.mxu0 %v2624_v1  ;;  %v292_v5 = vpack.c.bf16 %v287_v4, %v286_v3  ;;  %v3160_v6 = vld [vmem:[#allocation7 + $0x60] ss:$44 sps:$4 sm:$0xff]   ;;  %v3162_v7 = vld [vmem:[#allocation7 + $0x5c] ss:$44 sps:$4 sm:$0xff]   ;;  %v3168_v9 = vld [vmem:[#allocation7 + $0x4] ss:$44 sps:$4 sm:$0xff]   ;;  %429 = vmatprep.mubr.bf16.mxu1 %v2921_v10 }
  0x7d   : > { %2384 = vmatprep.subr.bf16.mxu0 %v2919_v0  ;;  %409 = vmatprep.subr.bf16.mxu1 %v3160_v6  ;;  %v3166_v8 = vld [vmem:[#allocation7 + $0x8] ss:$44 sps:$4 sm:$0xff]   ;;  %v2260_v12 = vld [vmem:[#allocation8] ss:$0 sm:$0xff]  ;;  %v3187_v20 = vld [vmem:[#allocation7 + $0xc] ss:$44 sps:$4 sm:$0xff]  }
  0x7e   : > { %410 = vmatpush1.bf16.msra.mxu1 %v3162_v7  ;;  %v3183_v19 = vld [vmem:[#allocation7 + $0x64] ss:$44 sps:$4 sm:$0xff]   ;;  %v3191_v22 = vshrl.u32 %v364_v21, 7  ;;  %s2922_s21 = smov 64   ;;  %vm516_vm2 = vcmask 130048   ;;  %s2923_s11 = smov 96  }
  0x7f   : > { %411 = vmatprep.subr.bf16.mxu1 %v3166_v8  ;;  %v362_v25 = vld [vmem:[#allocation8 + $0x1] sm:$0x3]  ;;  %v3212_v40 = vld [vmem:[#allocation8 + $0x3] ss:$0 sm:$0xff]  ;;  %v3222_v48 = vld [vmem:[#allocation7 + $0x68] ss:$44 sps:$4 sm:$0xff]  }
  0x80   : > { %2385 = vmatpush3.bf16.msra.mxu0 %v2625_v2  ;;  %v366_v23 = vsub.s32 0, %v3191_v22  ;;  %v370_v24 = vsub.s32 1, %v3191_v22  ;;  %v3217_v47 = vld [vmem:[%s3138_s29] sm:$0xff]   ;;  %s2924_s6 = smov 32   ;;  %s282_s9 = scalar_lea.vmem [#allocation10], %s2255_s5 }
  0x81   : > { %2390 = vmatprep.subr.bf16.mxu0 %v2919_v0  ;;  %v3226_v49 = vld [vmem:[#allocation7 + $0x10] ss:$44 sps:$4 sm:$0xff]   ;;  %v3233_v55 = vld [vmem:[#allocation8 + $0x4] ss:$0 sm:$0xff]  ;;  %s2128_s10 = sshll.u32 %s282_s9, 4  ;;  %s2324_s8 = sshll.u32 %s2974_s19, 8  ;;  %s3524_s10 = int_to_ptr.vmem [resolvable:$true] %s2128_s10 }
  0x82   : > { %412 = vmatpush1.bf16.msra.mxu1 %v3168_v9  ;;  %v3197_v26 = vrot.slane %v362_v25, %v366_v23  ;;  %v3201_v27 = vrot.slane %v362_v25, %v370_v24  ;;  %s3529_s26 = scalar_lea.hbm %s3576_s4, %s2324_s8  ;;  %s2115_s2 = scalar_lea.sflag [#allocation4], %s3126_s28 }
  0x83   : > { %2387 = vmatmul.mubr.msk.bf16.vlgmr.msra.gmra.mxu0 %vm312_vm1, %v292_v5  ;;  %2398 = vmatprep.subr.bf16.mxu1 %v2919_v0  ;;  %s2831_s27 = scalar_lea.vmem %s3524_s10, 256  ;;  %p3596_p13 = scmp.ne.s32.totalorder %s3588_s20, 0 }
  0x84   : > { %2394 = vmatprep.mubr.msk.bf16.mxu0 %vm2920_vm0, %v2919_v0  ;;  %2391 = vmatpush3.bf16.msra.mxu0 %v3183_v19  ;;  %p2832_p7 = scmp.ne.s32.totalorder %s3524_s10, %s2831_s27  ;;  %s2925_s19 = smov [#allocation10]  }
  0x85   : > { %2392 = vmatprep.subr.bf16.mxu0 %v2919_v0  ;;  %s2835_s5 = sshll.u32 %s2925_s19, 4  ;;  %s2836_s5 = int_to_ptr.vmem [resolvable:$false] %s2835_s5 }
  0x86   : > { %p2833_p0 = pnand %p2832_p7, %p3596_p13  ;;  %s2837_s25 = scalar_lea.vmem %s2836_s5, 512 }
  0x87   : > { %p2838_p3 = scmp.lt.s32.totalorder %s3524_s10, %s2836_s5  ;;  %p2839_p2 = scmp.lt.s32.totalorder %s2837_s25, %s2831_s27 }
  0x88   : > { %2393 = vmatpush3.bf16.msra.mxu0 %v3187_v20  ;;  %p2834_p5 = pneg %p2833_p0 }
  0x89   : > { %2404 = vmatprep.subr.bf16.mxu0 %v2919_v0  ;;  %p2840_p4 = por %p2839_p2, %p2838_p3 }
  0x8b   : > { %p2841_p6 = pnand %p2840_p4, %p2834_p5 }
 0x143   : > { %v350_v11 = vpop.f32.mrf.mxu0 }
 0x144   : > { %v3174_v15 = vadd.f32 %v2260_v12, %v350_v11 }
 0x145   : > { %v2388_v13 = vpop.f32.mrf.mxu0 }
 0x147   : > { %v353_v14 = vpop.f32.mrf.mxu0 }
 0x148   : > { %v3176_v16 = vadd.f32 %v2260_v12, %v353_v14 }
 0x149   : > { %v2389_v17 = vpop.f32.mrf.mxu0 }
 0x14a   : > { %v361_v18 = vpack.c.bf16 %v3176_v16, %v3174_v15 }
 0x14c   : > { %2268 = vmatmul.mubr.msk.bf16.vlgmr.msra.gmra.mxu1 %vm312_vm1, %v361_v18 }
 0x14d   : > { %2400 = vmatprep.mubr.msk.bf16.mxu1 %vm2920_vm0, %v2919_v0 }
 0x20c   : > { %v431_v28 = vpop.f32.mrf.mxu1 }
 0x20d   : > { %v432_v30 = vadd.f32 %v431_v28, %v3197_v26 }
 0x20e   : > { %v433_v29 = vpop.f32.mrf.mxu1 }
 0x20f   : > { %v434_v31 = vadd.f32 %v433_v29, %v3201_v27  ;;  %v440_v35 = vmax.f32 %v432_v30, 0.0 }
 0x210   : > { %v435_v32 = vpop.f32.mrf.mxu1 }
 0x211   : > { %v436_v33 = vadd.f32 %v435_v32, %v3197_v26  ;;  %645 = vrot.lane.b32.xlu0 %v434_v31, %s2922_s21 }
 0x212   : > { %v437_v34 = vpop.f32.mrf.mxu1 }
 0x213   : > { %v441_v36 = vmax.f32 %v436_v33, 0.0  ;;  %v438_v37 = vadd.f32 %v437_v34, %v3201_v27  ;;  %v3240_v34 = vld [vmem:[#allocation7 + $0x6c] ss:$44 sps:$4 sm:$0xff]  }
 0x215   : > { %v446_v38 = vpack.c.bf16 %v441_v36, %v440_v35  ;;  %647 = vrot.lane.b32.xlu0 %v438_v37, %s2922_s21  ;;  %v3242_v35 = vld [vmem:[#allocation7 + $0x70] ss:$44 sps:$4 sm:$0xff]   ;;  %v3244_v36 = vld [vmem:[#allocation7 + $0x18] ss:$44 sps:$4 sm:$0xff]  }
 0x217   : > { %2395 = vmatmul.mubr.msk.bf16.vlgmr.msra.gmra.mxu0 %vm312_vm1, %v446_v38  ;;  %v3250_v38 = vld [vmem:[#allocation7 + $0x14] ss:$44 sps:$4 sm:$0xff]  }
 0x218   : > { %2408 = vmatprep.mubr.msk.bf16.mxu0 %vm2920_vm0, %v2919_v0  ;;  %2405 = vmatpush3.bf16.msra.mxu0 %v3222_v48 }
 0x219   : > { %2406 = vmatprep.subr.bf16.mxu0 %v2919_v0 }
 0x21c   : > { %2407 = vmatpush3.bf16.msra.mxu0 %v3226_v49 }
 0x21d   : > { %2412 = vmatprep.subr.bf16.mxu0 %v2919_v0 }
 0x283   : > { %v646_v14 = vpop.permute.xlu0 %645 }
 0x287   : > { %v648_v25 = vpop.permute.xlu0 %647 }
 0x2d7   : > { %v503_v39 = vpop.f32.mrf.mxu0 }
 0x2d8   : > { %v504_v43 = vadd.f32 %v3212_v40, %v503_v39 }
 0x2d9   : > { %v2396_v41 = vpop.f32.mrf.mxu0 }
 0x2db   : > { %v506_v42 = vpop.f32.mrf.mxu0 }
 0x2dc   : > { %v507_v44 = vadd.f32 %v3212_v40, %v506_v42 }
 0x2dd   : > { %v2397_v45 = vpop.f32.mrf.mxu0 }
 0x2de   : > { %v510_v46 = vpack.c.bf16 %v507_v44, %v504_v43 }
 0x2e0   : > { %2399 = vmatpush3.bf16.msra.mxu1 %v510_v46 }
 0x2e1   : > { %744 = vmatprep.subr.bf16.mxu1 %v3242_v35 }
 0x2e3   : > { %2401 = vmatmul.mubr.msk.bf16.vlgmr.msra.gmra.mxu1 %vm516_vm2, %v3217_v47 }
 0x2e4   : > { %764 = vmatprep.mubr.bf16.mxu1 %v2921_v10  ;;  %745 = vmatpush1.bf16.msra.mxu1 %v3240_v34 }
 0x2e5   : > { %746 = vmatprep.subr.bf16.mxu1 %v3244_v36 }
 0x2e8   : > { %747 = vmatpush1.bf16.msra.mxu1 %v3250_v38 }
 0x2e9   : > { %2420 = vmatprep.subr.bf16.mxu1 %v2919_v0 }
 0x3a3   : > { %v554_v50 = vpop.f32.mrf.mxu1 }
 0x3a5   : > { %v2402_v51 = vpop.f32.mrf.mxu1 }
 0x3a7   : > { %v557_v52 = vpop.f32.mrf.mxu1 }
 0x3a8   : > { %v565_v53 = vpack.c.bf16 %v557_v52, %v554_v50 }
 0x3a9   : > { %v2403_v54 = vpop.f32.mrf.mxu1 }
 0x3aa   : > { %2409 = vmatmul.mubr.msk.bf16.vlgmr.msra.gmra.mxu0 %vm312_vm1, %v565_v53 }
 0x3ab   : > { %2416 = vmatprep.mubr.msk.bf16.mxu0 %vm2920_vm0, %v2919_v0 }
 0x46a   : > { %v622_v56 = vpop.f32.mrf.mxu0 }
 0x46b   : > { %v623_v57 = vadd.f32 %v3233_v55, %v622_v56  ;;  %v3267_v56 = vld [vmem:[#allocation7 + $0x74] ss:$44 sps:$4 sm:$0xff]  }
 0x46c   : > { %v2410_v58 = vpop.f32.mrf.mxu0  ;;  %2413 = vmatpush3.bf16.msra.mxu0 %v3267_v56 }
 0x46d   : > { %v629_v59 = vadd.f32 %v623_v57, %v434_v31  ;;  %2414 = vmatprep.subr.bf16.mxu0 %v2919_v0  ;;  %v694_v58 = vld [vmem:[#allocation8 + $0x5] sm:$0x3] }
 0x46e   : > { %v625_v60 = vpop.f32.mrf.mxu0 }
 0x46f   : > { %v631_v61 = vsub.f32 0.0, %v629_v59  ;;  %v626_v62 = vadd.f32 %v3233_v55, %v625_v60  ;;  %v3277_v59 = vrot.slane %v694_v58, %v366_v23  ;;  %v3281_v60 = vrot.slane %v694_v58, %v370_v24  ;;  %v3292_v24 = vld [vmem:[#allocation8 + $0x7] ss:$0 sm:$0xff] }
 0x470   : > { %v2411_v63 = vpop.f32.mrf.mxu0 }
 0x471   : > { %v633_v1 = vmul.f32 1.442695, %v631_v61  ;;  %v630_v2 = vadd.f32 %v626_v62, %v438_v37 }
 0x473   : > { %2651 = vpow2.f32 %v633_v1  ;;  %v632_v3 = vsub.f32 0.0, %v630_v2 }
 0x475   : > { %v635_v4 = vmul.f32 1.442695, %v632_v3 }
 0x477   : > { %2653 = vpow2.f32 %v635_v4 }
 0x480   : > { %v2652_v5 = vpop.eup %2651 }
 0x481   : > { %v637_v11 = vadd.f32 1.0, %v2652_v5 }
 0x483   : > { %2655 = vrcp.f32 %v637_v11 }
 0x484   : > { %v2654_v12 = vpop.eup %2653 }
 0x485   : > { %v638_v13 = vadd.f32 1.0, %v2654_v12 }
 0x487   : > { %2657 = vrcp.f32 %v638_v13 }
 0x490   : > { %v2656_v17 = vpop.eup %2655 }
 0x491   : > { %v651_v18 = vmul.f32 %v2656_v17, %v646_v14 }
 0x493   : > { %655 = vrot.lane.b32.xlu1 %v651_v18, %s2922_s21 }
 0x494   : > { %v2658_v21 = vpop.eup %2657 }
 0x495   : > { %v652_v28 = vmul.f32 %v2658_v21, %v648_v25  ;;  %v666_v44 = vsub.f32 1.0, %v2658_v21 }
 0x497   : > { %657 = vrot.lane.b32.xlu1 %v652_v28, %s2922_s21 }
 0x505   : > { %v656_v29 = vpop.permute.xlu1 %655 }
 0x506   : > { %v661_v30 = vadd.f32 %v656_v29, %v623_v57  ;;  %v3271_v57 = vld [vmem:[#allocation7 + $0x1c] ss:$44 sps:$4 sm:$0xff]   ;;  %v3306_v29 = vld [vmem:[#allocation7 + $0x78] ss:$44 sps:$4 sm:$0xff]  }
 0x507   : > { %2415 = vmatpush3.bf16.msra.mxu0 %v3271_v57 }
 0x508   : > { %2659 = vtanh.f32 %v661_v30  ;;  %2426 = vmatprep.subr.bf16.mxu0 %v2919_v0  ;;  %v3310_v30 = vld [vmem:[#allocation7 + $0x20] ss:$44 sps:$4 sm:$0xff]  }
 0x509   : > { %v658_v31 = vpop.permute.xlu1 %657 }
 0x50a   : > { %v662_v32 = vadd.f32 %v658_v31, %v626_v62 }
 0x50c   : > { %2661 = vtanh.f32 %v662_v32 }
 0x515   : > { %v2660_v33 = vpop.eup %2659 }
 0x516   : > { %669 = vrot.lane.b32.xlu0 %v2660_v33, %s2923_s11 }
 0x519   : > { %v2662_v37 = vpop.eup %2661 }
 0x51a   : > { %679 = vrot.lane.b32.xlu0 %v3174_v15, %s2924_s6  ;;  %671 = vrot.lane.b32.xlu1 %v2662_v37, %s2923_s11  ;;  %v665_v15 = vsub.f32 1.0, %v2656_v17 }
 0x51e   : > { %681 = vrot.lane.b32.xlu1 %v3176_v16, %s2924_s6 }
 0x541   : > { %847 = vxpose.xlu1.c.b16.start.end [1/1] (short) (narrow) %v3217_v47, 16 }
 0x588   : > { %v670_v39 = vpop.permute.xlu0 %669 }
 0x589   : > { %v675_v46 = vmul.f32 %v670_v39, %v665_v15 }
 0x58c   : > { %v680_v41 = vpop.permute.xlu0 %679  ;;  %v672_v42 = vpop.permute.xlu1 %671 }
 0x58d   : > { %v685_v43 = vmul.f32 %v2656_v17, %v680_v41  ;;  %v676_v50 = vmul.f32 %v672_v42, %v666_v44  ;;  %v3321_v41 = vld [vmem:[#allocation8 + $0x8] ss:$0 sm:$0xff] }
 0x58f   : > { %v3257_v52 = vadd.f32 %v685_v43, %v675_v46 }
 0x590   : > { %v682_v45 = vpop.permute.xlu1 %681 }
 0x591   : > { %v686_v51 = vmul.f32 %v2658_v21, %v682_v45 }
 0x593   : > { %v3259_v53 = vadd.f32 %v686_v51, %v676_v50 }
 0x595   : > { %v693_v16 = vpack.c.bf16 %v3259_v53, %v3257_v52 }
 0x597   : > { %707 = vrot.lane.b32.xlu0 %v693_v16, %s2923_s11 }
 0x5a3   : > { %v3296_v28 = vpop.trf.xlu1 }
 0x609   : > { %v708_v54 = vpop.permute.xlu0 %707 }
 0x60a   : > { %2283 = vmatmul.mubr.msk.bf16.vlgmr.msra.gmra.mxu1 %vm312_vm1, %v708_v54 }
 0x60b   : > { %2422 = vmatprep.mubr.msk.bf16.mxu1 %vm2920_vm0, %v2919_v0 }
 0x6ca   : > { %v766_v61 = vpop.f32.mrf.mxu1 }
 0x6cb   : > { %v767_v63 = vadd.f32 %v766_v61, %v3277_v59 }
 0x6cc   : > { %v768_v62 = vpop.f32.mrf.mxu1 }
 0x6cd   : > { %v769_v1 = vadd.f32 %v768_v62, %v3281_v60  ;;  %v775_v5 = vmax.f32 %v767_v63, 0.0 }
 0x6ce   : > { %v770_v2 = vpop.f32.mrf.mxu1 }
 0x6cf   : > { %v771_v3 = vadd.f32 %v770_v2, %v3277_v59  ;;  %991 = vrot.lane.b32.xlu0 %v769_v1, %s2922_s21 }
 0x6d0   : > { %v772_v4 = vpop.f32.mrf.mxu1 }
 0x6d1   : > { %v776_v11 = vmax.f32 %v771_v3, 0.0  ;;  %v773_v23 = vadd.f32 %v772_v4, %v3281_v60 }
 0x6d3   : > { %v781_v12 = vpack.c.bf16 %v776_v11, %v775_v5  ;;  %993 = vrot.lane.b32.xlu0 %v773_v23, %s2922_s21 }
 0x6d5   : > { %2417 = vmatmul.mubr.msk.bf16.vlgmr.msra.gmra.mxu0 %vm312_vm1, %v781_v12 }
 0x6d6   : > { %2430 = vmatprep.mubr.msk.bf16.mxu0 %vm2920_vm0, %v2919_v0  ;;  %2427 = vmatpush3.bf16.msra.mxu0 %v3306_v29 }
 0x6d7   : > { %2428 = vmatprep.subr.bf16.mxu0 %v2919_v0 }
 0x6da   : > { %2429 = vmatpush3.bf16.msra.mxu0 %v3310_v30 }
 0x6db   : > { %2434 = vmatprep.subr.bf16.mxu0 %v2919_v0 }
 0x741   : > { %v992_v4 = vpop.permute.xlu0 %991 }
 0x745   : > { %v994_v12 = vpop.permute.xlu0 %993 }
 0x795   : > { %v838_v22 = vpop.f32.mrf.mxu0 }
 0x796   : > { %v839_v17 = vadd.f32 %v3292_v24, %v838_v22 }
 0x797   : > { %v2418_v13 = vpop.f32.mrf.mxu0 }
 0x799   : > { %v841_v14 = vpop.f32.mrf.mxu0 }
 0x79a   : > { %v842_v18 = vadd.f32 %v3292_v24, %v841_v14 }
 0x79b   : > { %v2419_v21 = vpop.f32.mrf.mxu0 }
 0x79c   : > { %v845_v25 = vpack.c.bf16 %v842_v18, %v839_v17 }
 0x79e   : > { %2421 = vmatpush3.bf16.msra.mxu1 %v845_v25 }
 0x79f   : > { %1046 = vmatprep.subr.bf16.mxu1 %v3160_v6 }
 0x7a1   : > { %2423 = vmatmul.mubr.msk.bf16.vlgmr.msra.gmra.mxu1 %vm516_vm2, %v3296_v28 }
 0x7a2   : > { %1047 = vmatpush1.bf16.msra.mxu1 %v3162_v7  ;;  %1066 = vmatprep.mubr.bf16.mxu1 %v2921_v10 }
 0x7a3   : > { %1048 = vmatprep.subr.bf16.mxu1 %v3166_v8 }
 0x7a6   : > { %1049 = vmatpush1.bf16.msra.mxu1 %v3168_v9 }
 0x7a7   : > { %2442 = vmatprep.subr.bf16.mxu1 %v2919_v0 }
 0x861   : > { %v900_v31 = vpop.f32.mrf.mxu1 }
 0x863   : > { %v2424_v32 = vpop.f32.mrf.mxu1 }
 0x865   : > { %v903_v33 = vpop.f32.mrf.mxu1 }
 0x866   : > { %v911_v37 = vpack.c.bf16 %v903_v33, %v900_v31 }
 0x867   : > { %v2425_v39 = vpop.f32.mrf.mxu1 }
 0x868   : > { %2431 = vmatmul.mubr.msk.bf16.vlgmr.msra.gmra.mxu0 %vm312_vm1, %v911_v37 }
 0x869   : > { %2435 = vmatpush3.bf16.msra.mxu0 %v3183_v19  ;;  %2438 = vmatprep.mubr.msk.bf16.mxu0 %vm2920_vm0, %v2919_v0 }
 0x86a   : > { %2436 = vmatprep.subr.bf16.mxu0 %v2919_v0 }
 0x86d   : > { %2437 = vmatpush3.bf16.msra.mxu0 %v3187_v20 }
 0x86e   : > { %2448 = vmatprep.subr.bf16.mxu0 %v2919_v0 }
 0x928   : > { %v968_v42 = vpop.f32.mrf.mxu0 }
 0x929   : > { %v969_v15 = vadd.f32 %v3321_v41, %v968_v42 }
 0x92a   : > { %v2432_v43 = vpop.f32.mrf.mxu0 }
 0x92b   : > { %v975_v44 = vadd.f32 %v969_v15, %v769_v1 }
 0x92c   : > { %v971_v45 = vpop.f32.mrf.mxu0 }
 0x92d   : > { %v977_v46 = vsub.f32 0.0, %v975_v44  ;;  %v972_v50 = vadd.f32 %v3321_v41, %v971_v45 }
 0x92e   : > { %v2433_v51 = vpop.f32.mrf.mxu0 }
 0x92f   : > { %v979_v16 = vmul.f32 1.442695, %v977_v46  ;;  %v976_v54 = vadd.f32 %v972_v50, %v773_v23 }
 0x931   : > { %2663 = vpow2.f32 %v979_v16  ;;  %v978_v58 = vsub.f32 0.0, %v976_v54 }
 0x933   : > { %v981_v61 = vmul.f32 1.442695, %v978_v58 }
 0x935   : > { %2665 = vpow2.f32 %v981_v61 }
 0x93e   : > { %v2664_v62 = vpop.eup %2663 }
 0x93f   : > { %v983_v63 = vadd.f32 1.0, %v2664_v62 }
 0x941   : > { %2667 = vrcp.f32 %v983_v63 }
 0x942   : > { %v2666_v2 = vpop.eup %2665 }
 0x943   : > { %v984_v3 = vadd.f32 1.0, %v2666_v2 }
 0x945   : > { %2669 = vrcp.f32 %v984_v3 }
 0x94e   : > { %v2668_v5 = vpop.eup %2667 }
 0x94f   : > { %v997_v1 = vmul.f32 %v2668_v5, %v992_v4  ;;  %v1011_v31 = vsub.f32 1.0, %v2668_v5  ;;  %v1023_v39 = vmul.f32 %v2668_v5, %v3257_v52 }
 0x951   : > { %1001 = vrot.lane.b32.xlu0 %v997_v1, %s2922_s21 }
 0x952   : > { %v2670_v11 = vpop.eup %2669 }
 0x953   : > { %v998_v22 = vmul.f32 %v2670_v11, %v994_v12  ;;  %v1012_v33 = vsub.f32 1.0, %v2670_v11  ;;  %v1024_v42 = vmul.f32 %v2670_v11, %v3259_v53 }
 0x955   : > { %1003 = vrot.lane.b32.xlu0 %v998_v22, %s2922_s21 }
 0x9c3   : > { %v1002_v23 = vpop.permute.xlu0 %1001 }
 0x9c4   : > { %v1007_v13 = vadd.f32 %v1002_v23, %v969_v15 }
 0x9c6   : > { %2671 = vtanh.f32 %v1007_v13 }
 0x9c7   : > { %v1004_v14 = vpop.permute.xlu0 %1003 }
 0x9c8   : > { %v1008_v17 = vadd.f32 %v1004_v14, %v972_v50 }
 0x9ca   : > { %2673 = vtanh.f32 %v1008_v17 }
 0x9d3   : > { %v2672_v18 = vpop.eup %2671 }
 0x9d4   : > { %1015 = vrot.lane.b32.xlu0 %v2672_v18, %s2923_s11 }
 0x9d7   : > { %v2674_v21 = vpop.eup %2673 }
 0x9d8   : > { %1017 = vrot.lane.b32.xlu0 %v2674_v21, %s2923_s11 }
 0xa46   : > { %v1016_v25 = vpop.permute.xlu0 %1015 }
 0xa47   : > { %v1021_v32 = vmul.f32 %v1016_v25, %v1011_v31 }
 0xa49   : > { %v3331_v43 = vadd.f32 %v1023_v39, %v1021_v32 }
 0xa4a   : > { %v1018_v37 = vpop.permute.xlu0 %1017 }
 0xa4b   : > { %v1022_v15 = vmul.f32 %v1018_v37, %v1012_v33 }
 0xa4d   : > { %v3333_v44 = vadd.f32 %v1024_v42, %v1022_v15 }
 0xa4f   : > { %v1027_v45 = vpack.c.bf16 %v3333_v44, %v3331_v43 }
 0xa51   : > { %1029 = vrot.lane.b32.xlu0 %v1027_v45, %s2923_s11 }
 0xac3   : > { %v1030_v46 = vpop.permute.xlu0 %1029 }
 0xac4   : > { %2293 = vmatmul.mubr.msk.bf16.vlgmr.msra.gmra.mxu1 %vm312_vm1, %v1030_v46 }
 0xac5   : > { %2444 = vmatprep.mubr.msk.bf16.mxu1 %vm2920_vm0, %v2919_v0 }
 0xb84   : > { %v1068_v50 = vpop.f32.mrf.mxu1 }
 0xb85   : > { %v1069_v53 = vadd.f32 %v1068_v50, %v3197_v26 }
 0xb86   : > { %v1070_v52 = vpop.f32.mrf.mxu1 }
 0xb87   : > { %v1071_v51 = vadd.f32 %v1070_v52, %v3201_v27  ;;  %v1077_v61 = vmax.f32 %v1069_v53, 0.0 }
 0xb88   : > { %v1072_v16 = vpop.f32.mrf.mxu1 }
 0xb89   : > { %v1073_v54 = vadd.f32 %v1072_v16, %v3197_v26  ;;  %1227 = vrot.lane.b32.xlu0 %v1071_v51, %s2922_s21 }
 0xb8a   : > { %v1074_v58 = vpop.f32.mrf.mxu1 }
 0xb8b   : > { %v1078_v62 = vmax.f32 %v1073_v54, 0.0  ;;  %v1075_v63 = vadd.f32 %v1074_v58, %v3201_v27 }
 0xb8d   : > { %v1079_v2 = vpack.c.bf16 %v1078_v62, %v1077_v61  ;;  %1229 = vrot.lane.b32.xlu1 %v1075_v63, %s2922_s21 }
 0xb8f   : > { %2439 = vmatmul.mubr.msk.bf16.vlgmr.msra.gmra.mxu0 %vm312_vm1, %v1079_v2 }
 0xb90   : > { %2449 = vmatpush3.bf16.msra.mxu0 %v3222_v48  ;;  %2452 = vmatprep.mubr.msk.bf16.mxu0 %vm2920_vm0, %v2919_v0 }
 0xb91   : > { %2450 = vmatprep.subr.bf16.mxu0 %v2919_v0 }
 0xb94   : > { %2451 = vmatpush3.bf16.msra.mxu0 %v3226_v49 }
 0xb95   : > { %2456 = vmatprep.subr.bf16.mxu0 %v2919_v0 }
 0xbfb   : > { %v1228_v61 = vpop.permute.xlu0 %1227 }
 0xbff   : > { %v1230_v2 = vpop.permute.xlu1 %1229 }
 0xc4f   : > { %v1117_v3 = vpop.f32.mrf.mxu0 }
 0xc50   : > { %v1118_v1 = vadd.f32 %v3212_v40, %v1117_v3 }
 0xc51   : > { %v2440_v4 = vpop.f32.mrf.mxu0 }
 0xc53   : > { %v1120_v5 = vpop.f32.mrf.mxu0 }
 0xc54   : > { %v1121_v11 = vadd.f32 %v3212_v40, %v1120_v5 }
 0xc55   : > { %v2441_v12 = vpop.f32.mrf.mxu0 }
 0xc56   : > { %v1124_v22 = vpack.c.bf16 %v1121_v11, %v1118_v1 }
 0xc58   : > { %2443 = vmatpush3.bf16.msra.mxu1 %v1124_v22 }
 0xc59   : > { %1282 = vmatprep.subr.bf16.mxu1 %v3242_v35 }
 0xc5b   : > { %2445 = vmatmul.mubr.msk.bf16.vlgmr.msra.gmra.mxu1 %vm516_vm2, %v3217_v47 }
 0xc5c   : > { %1283 = vmatpush1.bf16.msra.mxu1 %v3240_v34  ;;  %1302 = vmatprep.mubr.bf16.mxu1 %v2921_v10 }
 0xc5d   : > { %1284 = vmatprep.subr.bf16.mxu1 %v3244_v36 }
 0xc60   : > { %1285 = vmatpush1.bf16.msra.mxu1 %v3250_v38 }
 0xc61   : > { %2464 = vmatprep.subr.bf16.mxu1 %v2919_v0 }
 0xd1b   : > { %v1159_v23 = vpop.f32.mrf.mxu1 }
 0xd1d   : > { %v2446_v13 = vpop.f32.mrf.mxu1 }
 0xd1f   : > { %v1162_v14 = vpop.f32.mrf.mxu1 }
 0xd20   : > { %v1166_v17 = vpack.c.bf16 %v1162_v14, %v1159_v23 }
 0xd21   : > { %v2447_v18 = vpop.f32.mrf.mxu1 }
 0xd22   : > { %2453 = vmatmul.mubr.msk.bf16.vlgmr.msra.gmra.mxu0 %vm312_vm1, %v1166_v17 }
 0xd23   : > { %2457 = vmatpush3.bf16.msra.mxu0 %v3267_v56  ;;  %2460 = vmatprep.mubr.msk.bf16.mxu0 %vm2920_vm0, %v2919_v0 }
 0xd24   : > { %2458 = vmatprep.subr.bf16.mxu0 %v2919_v0 }
 0xd27   : > { %2459 = vmatpush3.bf16.msra.mxu0 %v3271_v57 }
 0xd28   : > { %2470 = vmatprep.subr.bf16.mxu0 %v2919_v0 }
 0xde2   : > { %v1204_v21 = vpop.f32.mrf.mxu0 }
 0xde3   : > { %v1205_v25 = vadd.f32 %v3233_v55, %v1204_v21 }
 0xde4   : > { %v2454_v31 = vpop.f32.mrf.mxu0 }
 0xde5   : > { %v1211_v32 = vadd.f32 %v1205_v25, %v1071_v51 }
 0xde6   : > { %v1207_v33 = vpop.f32.mrf.mxu0 }
 0xde7   : > { %v1213_v37 = vsub.f32 0.0, %v1211_v32  ;;  %v1208_v39 = vadd.f32 %v3233_v55, %v1207_v33 }
 0xde8   : > { %v2455_v42 = vpop.f32.mrf.mxu0 }
 0xde9   : > { %v1215_v15 = vmul.f32 1.442695, %v1213_v37  ;;  %v1212_v45 = vadd.f32 %v1208_v39, %v1075_v63 }
 0xdeb   : > { %2675 = vpow2.f32 %v1215_v15  ;;  %v1214_v46 = vsub.f32 0.0, %v1212_v45 }
 0xded   : > { %v1217_v50 = vmul.f32 1.442695, %v1214_v46 }
 0xdef   : > { %2677 = vpow2.f32 %v1217_v50 }
 0xdf8   : > { %v2676_v52 = vpop.eup %2675 }
 0xdf9   : > { %v1219_v53 = vadd.f32 1.0, %v2676_v52 }
 0xdfb   : > { %2679 = vrcp.f32 %v1219_v53 }
 0xdfc   : > { %v2678_v16 = vpop.eup %2677 }
 0xdfd   : > { %v1220_v54 = vadd.f32 1.0, %v2678_v16 }
 0xdff   : > { %2681 = vrcp.f32 %v1220_v54 }
 0xe08   : > { %v2680_v58 = vpop.eup %2679 }
 0xe09   : > { %v1233_v51 = vmul.f32 %v2680_v58, %v1228_v61  ;;  %v1247_v23 = vsub.f32 1.0, %v2680_v58  ;;  %v1259_v18 = vmul.f32 %v2680_v58, %v3331_v43 }
 0xe0b   : > { %1237 = vrot.lane.b32.xlu0 %v1233_v51, %s2922_s21 }
 0xe0c   : > { %v2682_v62 = vpop.eup %2681 }
 0xe0d   : > { %v1234_v3 = vmul.f32 %v2682_v62, %v1230_v2  ;;  %v1248_v14 = vsub.f32 1.0, %v2682_v62  ;;  %v1260_v21 = vmul.f32 %v2682_v62, %v3333_v44 }
 0xe0f   : > { %1239 = vrot.lane.b32.xlu1 %v1234_v3, %s2922_s21 }
 0xe7d   : > { %v1238_v63 = vpop.permute.xlu0 %1237 }
 0xe7e   : > { %v1243_v4 = vadd.f32 %v1238_v63, %v1205_v25 }
 0xe80   : > { %2683 = vtanh.f32 %v1243_v4 }
 0xe81   : > { %v1240_v5 = vpop.permute.xlu1 %1239 }
 0xe82   : > { %v1244_v1 = vadd.f32 %v1240_v5, %v1208_v39 }
 0xe84   : > { %2685 = vtanh.f32 %v1244_v1 }
 0xe8d   : > { %v2684_v11 = vpop.eup %2683 }
 0xe8e   : > { %1251 = vrot.lane.b32.xlu0 %v2684_v11, %s2923_s11 }
 0xe91   : > { %v2686_v12 = vpop.eup %2685 }
 0xe92   : > { %1253 = vrot.lane.b32.xlu1 %v2686_v12, %s2923_s11 }
 0xf00   : > { %v1252_v22 = vpop.permute.xlu0 %1251 }
 0xf01   : > { %v1257_v13 = vmul.f32 %v1252_v22, %v1247_v23 }
 0xf03   : > { %v3379_v31 = vadd.f32 %v1259_v18, %v1257_v13 }
 0xf04   : > { %v1254_v17 = vpop.permute.xlu1 %1253 }
 0xf05   : > { %v1258_v25 = vmul.f32 %v1254_v17, %v1248_v14 }
 0xf07   : > { %v3381_v32 = vadd.f32 %v1260_v21, %v1258_v25 }
 0xf09   : > { %v1263_v33 = vpack.c.bf16 %v3381_v32, %v3379_v31 }
 0xf0b   : > { %1265 = vrot.lane.b32.xlu0 %v1263_v33, %s2923_s11 }
 0xf7d   : > { %v1266_v37 = vpop.permute.xlu0 %1265 }
 0xf7e   : > { %2297 = vmatmul.mubr.msk.bf16.vlgmr.msra.gmra.mxu1 %vm312_vm1, %v1266_v37 }
 0xf7f   : > { %2466 = vmatprep.mubr.msk.bf16.mxu1 %vm2920_vm0, %v2919_v0 }
0x103e   : > { %v1304_v39 = vpop.f32.mrf.mxu1 }
0x103f   : > { %v1305_v44 = vadd.f32 %v1304_v39, %v3277_v59 }
0x1040   : > { %v1306_v43 = vpop.f32.mrf.mxu1 }
0x1041   : > { %v1307_v42 = vadd.f32 %v1306_v43, %v3281_v60  ;;  %v1313_v50 = vmax.f32 %v1305_v44, 0.0 }
0x1042   : > { %v1308_v15 = vpop.f32.mrf.mxu1 }
0x1043   : > { %v1309_v45 = vadd.f32 %v1308_v15, %v3277_v59  ;;  %1463 = vrot.lane.b32.xlu1 %v1307_v42, %s2922_s21 }
0x1044   : > { %v1310_v46 = vpop.f32.mrf.mxu1 }
0x1045   : > { %v1314_v52 = vmax.f32 %v1309_v45, 0.0  ;;  %v1311_v53 = vadd.f32 %v1310_v46, %v3281_v60 }
0x1047   : > { %v1315_v16 = vpack.c.bf16 %v1314_v52, %v1313_v50  ;;  %1465 = vrot.lane.b32.xlu0 %v1311_v53, %s2922_s21 }
0x1049   : > { %2461 = vmatmul.mubr.msk.bf16.vlgmr.msra.gmra.mxu0 %vm312_vm1, %v1315_v16 }
0x104a   : > { %2471 = vmatpush3.bf16.msra.mxu0 %v3306_v29  ;;  %2474 = vmatprep.mubr.msk.bf16.mxu0 %vm2920_vm0, %v2919_v0 }
0x104b   : > { %2472 = vmatprep.subr.bf16.mxu0 %v2919_v0 }
0x104e   : > { %2473 = vmatpush3.bf16.msra.mxu0 %v3310_v30 }
0x104f   : > { %2478 = vmatprep.subr.bf16.mxu0 %v2919_v0 }
0x10b5   : > { %v1464_v39 = vpop.permute.xlu1 %1463 }
0x1109   : > { %v1353_v54 = vpop.f32.mrf.mxu0 }
0x110a   : > { %v1354_v51 = vadd.f32 %v3292_v24, %v1353_v54 }
0x110b   : > { %v2462_v58 = vpop.f32.mrf.mxu0 }
0x110d   : > { %v1356_v61 = vpop.f32.mrf.mxu0 }
0x110e   : > { %v1357_v62 = vadd.f32 %v3292_v24, %v1356_v61 }
0x110f   : > { %v2463_v2 = vpop.f32.mrf.mxu0 }
0x1110   : > { %v1360_v3 = vpack.c.bf16 %v1357_v62, %v1354_v51 }
0x1112   : > { %2465 = vmatpush3.bf16.msra.mxu1 %v1360_v3 }
0x1113   : > { %1518 = vmatprep.subr.bf16.mxu1 %v3160_v6 }
0x1115   : > { %2467 = vmatmul.mubr.msk.bf16.vlgmr.msra.gmra.mxu1 %vm516_vm2, %v3296_v28 }
0x1116   : > { %1519 = vmatpush1.bf16.msra.mxu1 %v3162_v7  ;;  %1538 = vmatprep.mubr.bf16.mxu1 %v2921_v10 }
0x1117   : > { %1520 = vmatprep.subr.bf16.mxu1 %v3166_v8 }
0x111a   : > { %1521 = vmatpush1.bf16.msra.mxu1 %v3168_v9 }
0x111b   : > { %2486 = vmatprep.subr.bf16.mxu1 %v2919_v0 }
0x11d5   : > { %v1395_v63 = vpop.f32.mrf.mxu1 }
0x11d7   : > { %v2468_v4 = vpop.f32.mrf.mxu1 }
0x11d9   : > { %v1398_v5 = vpop.f32.mrf.mxu1 }
0x11da   : > { %v1402_v1 = vpack.c.bf16 %v1398_v5, %v1395_v63 }
0x11db   : > { %v2469_v11 = vpop.f32.mrf.mxu1 }
0x11dc   : > { %2475 = vmatmul.mubr.msk.bf16.vlgmr.msra.gmra.mxu0 %vm312_vm1, %v1402_v1 }
0x11dd   : > { %2479 = vmatpush3.bf16.msra.mxu0 %v3183_v19  ;;  %2482 = vmatprep.mubr.msk.bf16.mxu0 %vm2920_vm0, %v2919_v0 }
0x11de   : > { %2480 = vmatprep.subr.bf16.mxu0 %v2919_v0 }
0x11e1   : > { %2481 = vmatpush3.bf16.msra.mxu0 %v3187_v20 }
0x11e2   : > { %2492 = vmatprep.subr.bf16.mxu0 %v2919_v0 }
0x129c   : > { %v1440_v6 = vpop.f32.mrf.mxu0 }
0x129d   : > { %v1441_v7 = vadd.f32 %v3321_v41, %v1440_v6 }
0x129e   : > { %v2476_v8 = vpop.f32.mrf.mxu0 }
0x129f   : > { %v1447_v9 = vadd.f32 %v1441_v7, %v1307_v42  ;;  %v1466_v42 = vpop.permute.xlu0 %1465 }
0x12a0   : > { %v1443_v12 = vpop.f32.mrf.mxu0 }
0x12a1   : > { %v1449_v22 = vsub.f32 0.0, %v1447_v9  ;;  %v1444_v23 = vadd.f32 %v3321_v41, %v1443_v12 }
0x12a2   : > { %v2477_v13 = vpop.f32.mrf.mxu0 }
0x12a3   : > { %v1451_v19 = vmul.f32 1.442695, %v1449_v22  ;;  %v1448_v14 = vadd.f32 %v1444_v23, %v1311_v53 }
0x12a5   : > { %2687 = vpow2.f32 %v1451_v19  ;;  %v1450_v17 = vsub.f32 0.0, %v1448_v14 }
0x12a7   : > { %v1453_v18 = vmul.f32 1.442695, %v1450_v17 }
0x12a9   : > { %2689 = vpow2.f32 %v1453_v18 }
0x12b2   : > { %v2688_v21 = vpop.eup %2687 }
0x12b3   : > { %v1455_v20 = vadd.f32 1.0, %v2688_v21 }
0x12b5   : > { %2691 = vrcp.f32 %v1455_v20 }
0x12b6   : > { %v2690_v25 = vpop.eup %2689 }
0x12b7   : > { %v1456_v33 = vadd.f32 1.0, %v2690_v25 }
0x12b9   : > { %2693 = vrcp.f32 %v1456_v33 }
0x12c2   : > { %v2692_v37 = vpop.eup %2691 }
0x12c3   : > { %v1469_v43 = vmul.f32 %v2692_v37, %v1464_v39  ;;  %v1483_v58 = vsub.f32 1.0, %v2692_v37  ;;  %v1495_v2 = vmul.f32 %v2692_v37, %v3379_v31 }
0x12c5   : > { %1473 = vrot.lane.b32.xlu1 %v1469_v43, %s2922_s21 }
0x12c6   : > { %v2694_v44 = vpop.eup %2693 }
0x12c7   : > { %v1470_v15 = vmul.f32 %v2694_v44, %v1466_v42  ;;  %v1484_v51 = vsub.f32 1.0, %v2694_v44  ;;  %v1496_v3 = vmul.f32 %v2694_v44, %v3381_v32 }
0x12c9   : > { %1475 = vrot.lane.b32.xlu0 %v1470_v15, %s2922_s21 }
0x1337   : > { %v1474_v45 = vpop.permute.xlu1 %1473 }
0x1338   : > { %v1479_v46 = vadd.f32 %v1474_v45, %v1441_v7 }
0x133a   : > { %2695 = vtanh.f32 %v1479_v46 }
0x133b   : > { %v1476_v50 = vpop.permute.xlu0 %1475 }
0x133c   : > { %v1480_v52 = vadd.f32 %v1476_v50, %v1444_v23 }
0x133e   : > { %2697 = vtanh.f32 %v1480_v52 }
0x1347   : > { %v2696_v53 = vpop.eup %2695 }
0x1348   : > { %1487 = vrot.lane.b32.xlu1 %v2696_v53, %s2923_s11 }
0x134b   : > { %v2698_v16 = vpop.eup %2697 }
0x134c   : > { %1489 = vrot.lane.b32.xlu0 %v2698_v16, %s2923_s11 }
0x13ba   : > { %v1488_v54 = vpop.permute.xlu1 %1487 }
0x13bb   : > { %v1493_v61 = vmul.f32 %v1488_v54, %v1483_v58 }
0x13bd   : > { %v3427_v4 = vadd.f32 %v1495_v2, %v1493_v61 }
0x13be   : > { %v1490_v62 = vpop.permute.xlu0 %1489 }
0x13bf   : > { %v1494_v63 = vmul.f32 %v1490_v62, %v1484_v51 }
0x13c1   : > { %v3429_v5 = vadd.f32 %v1496_v3, %v1494_v63 }
0x13c3   : > { %v1499_v1 = vpack.c.bf16 %v3429_v5, %v3427_v4 }
0x13c5   : > { %1501 = vrot.lane.b32.xlu1 %v1499_v1, %s2923_s11 }
0x1437   : > { %v1502_v11 = vpop.permute.xlu1 %1501 }
0x1438   : > { %2301 = vmatmul.mubr.msk.bf16.vlgmr.msra.gmra.mxu1 %vm312_vm1, %v1502_v11 }
0x1439   : > { %2488 = vmatprep.mubr.msk.bf16.mxu1 %vm2920_vm0, %v2919_v0 }
0x14f8   : > { %v1540_v6 = vpop.f32.mrf.mxu1 }
0x14f9   : > { %v1541_v32 = vadd.f32 %v1540_v6, %v3197_v26 }
0x14fa   : > { %v1542_v31 = vpop.f32.mrf.mxu1 }
0x14fb   : > { %v1543_v7 = vadd.f32 %v1542_v31, %v3201_v27  ;;  %v1549_v22 = vmax.f32 %v1541_v32, 0.0 }
0x14fc   : > { %v1544_v8 = vpop.f32.mrf.mxu1 }
0x14fd   : > { %v1545_v9 = vadd.f32 %v1544_v8, %v3197_v26  ;;  %1699 = vrot.lane.b32.xlu0 %v1543_v7, %s2922_s21 }
0x14fe   : > { %v1546_v12 = vpop.f32.mrf.mxu1 }
0x14ff   : > { %v1550_v23 = vmax.f32 %v1545_v9, 0.0  ;;  %v1547_v13 = vadd.f32 %v1546_v12, %v3201_v27 }
0x1501   : > { %v1551_v19 = vpack.c.bf16 %v1550_v23, %v1549_v22  ;;  %1701 = vrot.lane.b32.xlu1 %v1547_v13, %s2922_s21 }
0x1503   : > { %2483 = vmatmul.mubr.msk.bf16.vlgmr.msra.gmra.mxu0 %vm312_vm1, %v1551_v19 }
0x1504   : > { %2493 = vmatpush3.bf16.msra.mxu0 %v3222_v48  ;;  %2496 = vmatprep.mubr.msk.bf16.mxu0 %vm2920_vm0, %v2919_v0 }
0x1505   : > { %2494 = vmatprep.subr.bf16.mxu0 %v2919_v0 }
0x1508   : > { %2495 = vmatpush3.bf16.msra.mxu0 %v3226_v49 }
0x1509   : > { %2500 = vmatprep.subr.bf16.mxu0 %v2919_v0 }
0x156f   : > { %v1700_v52 = vpop.permute.xlu0 %1699 }
0x15c3   : > { %v1589_v26 = vpop.f32.mrf.mxu0 }
0x15c4   : > { %v1590_v27 = vadd.f32 %v3212_v40, %v1589_v26 }
0x15c5   : > { %v2484_v14 = vpop.f32.mrf.mxu0 }
0x15c7   : > { %v1592_v17 = vpop.f32.mrf.mxu0 }
0x15c8   : > { %v1593_v18 = vadd.f32 %v3212_v40, %v1592_v17 }
0x15c9   : > { %v2485_v21 = vpop.f32.mrf.mxu0 }
0x15ca   : > { %v1596_v20 = vpack.c.bf16 %v1593_v18, %v1590_v27 }
0x15cc   : > { %2487 = vmatpush3.bf16.msra.mxu1 %v1596_v20 }
0x15cd   : > { %1754 = vmatprep.subr.bf16.mxu1 %v3242_v35 }
0x15cf   : > { %2489 = vmatmul.mubr.msk.bf16.vlgmr.msra.gmra.mxu1 %vm516_vm2, %v3217_v47 }
0x15d0   : > { %1755 = vmatpush1.bf16.msra.mxu1 %v3240_v34  ;;  %1774 = vmatprep.mubr.bf16.mxu1 %v2921_v10 }
0x15d1   : > { %1756 = vmatprep.subr.bf16.mxu1 %v3244_v36 }
0x15d4   : > { %1757 = vmatpush1.bf16.msra.mxu1 %v3250_v38 }
0x15d5   : > { %2508 = vmatprep.subr.bf16.mxu1 %v2919_v0 }
0x168f   : > { %v1631_v48 = vpop.f32.mrf.mxu1 }
0x1691   : > { %v2490_v40 = vpop.f32.mrf.mxu1 }
0x1693   : > { %v1634_v49 = vpop.f32.mrf.mxu1 }
0x1694   : > { %v1638_v25 = vpack.c.bf16 %v1634_v49, %v1631_v48 }
0x1695   : > { %v2491_v33 = vpop.f32.mrf.mxu1 }
0x1696   : > { %2497 = vmatmul.mubr.msk.bf16.vlgmr.msra.gmra.mxu0 %vm312_vm1, %v1638_v25 }
0x1697   : > { %2501 = vmatpush3.bf16.msra.mxu0 %v3267_v56  ;;  %2504 = vmatprep.mubr.msk.bf16.mxu0 %vm2920_vm0, %v2919_v0 }
0x1698   : > { %2502 = vmatprep.subr.bf16.mxu0 %v2919_v0 }
0x169b   : > { %2503 = vmatpush3.bf16.msra.mxu0 %v3271_v57 }
0x169c   : > { %2514 = vmatprep.subr.bf16.mxu0 %v2919_v0 }
0x1756   : > { %v1676_v10 = vpop.f32.mrf.mxu0 }
0x1757   : > { %v1677_v47 = vadd.f32 %v3233_v55, %v1676_v10 }
0x1758   : > { %v2498_v34 = vpop.f32.mrf.mxu0 }
0x1759   : > { %v1683_v35 = vadd.f32 %v1677_v47, %v1543_v7 }
0x175a   : > { %v1679_v36 = vpop.f32.mrf.mxu0 }
0x175b   : > { %v1685_v38 = vsub.f32 0.0, %v1683_v35  ;;  %v1680_v37 = vadd.f32 %v3233_v55, %v1679_v36  ;;  %v1702_v55 = vpop.permute.xlu1 %1701 }
0x175c   : > { %v2499_v39 = vpop.f32.mrf.mxu0 }
0x175d   : > { %v1687_v56 = vmul.f32 1.442695, %v1685_v38  ;;  %v1684_v43 = vadd.f32 %v1680_v37, %v1547_v13 }
0x175f   : > { %2699 = vpow2.f32 %v1687_v56  ;;  %v1686_v44 = vsub.f32 0.0, %v1684_v43 }
0x1761   : > { %v1689_v42 = vmul.f32 1.442695, %v1686_v44 }
0x1763   : > { %2701 = vpow2.f32 %v1689_v42 }
0x176c   : > { %v2700_v15 = vpop.eup %2699 }
0x176d   : > { %v1691_v57 = vadd.f32 1.0, %v2700_v15 }
0x176f   : > { %2703 = vrcp.f32 %v1691_v57 }
0x1770   : > { %v2702_v45 = vpop.eup %2701 }
0x1771   : > { %v1692_v46 = vadd.f32 1.0, %v2702_v45 }
0x1773   : > { %2705 = vrcp.f32 %v1692_v46 }
0x177c   : > { %v2704_v50 = vpop.eup %2703 }
0x177d   : > { %v1705_v53 = vmul.f32 %v2704_v50, %v1700_v52  ;;  %v1719_v1 = vsub.f32 1.0, %v2704_v50  ;;  %v1731_v32 = vmul.f32 %v2704_v50, %v3427_v4 }
0x177f   : > { %1709 = vrot.lane.b32.xlu0 %v1705_v53, %s2922_s21 }
0x1780   : > { %v2706_v16 = vpop.eup %2705 }
0x1781   : > { %v1706_v54 = vmul.f32 %v2706_v16, %v1702_v55  ;;  %v1720_v6 = vsub.f32 1.0, %v2706_v16  ;;  %v1732_v7 = vmul.f32 %v2706_v16, %v3429_v5 }
0x1783   : > { %1711 = vrot.lane.b32.xlu1 %v1706_v54, %s2922_s21 }
0x17f1   : > { %v1710_v58 = vpop.permute.xlu0 %1709 }
0x17f2   : > { %v1715_v61 = vadd.f32 %v1710_v58, %v1677_v47 }
0x17f4   : > { %2707 = vtanh.f32 %v1715_v61 }
0x17f5   : > { %v1712_v51 = vpop.permute.xlu1 %1711 }
0x17f6   : > { %v1716_v62 = vadd.f32 %v1712_v51, %v1680_v37 }
0x17f8   : > { %2709 = vtanh.f32 %v1716_v62 }
0x1801   : > { %v2708_v2 = vpop.eup %2707 }
0x1802   : > { %1723 = vrot.lane.b32.xlu0 %v2708_v2, %s2923_s11  ;;  %v2647_v2 = vld [vmem:[#allocation7 + $0x7c] ss:$44 sps:$4 sm:$0xff]  }
0x1805   : > { %v2710_v3 = vpop.eup %2709 }
0x1806   : > { %1725 = vrot.lane.b32.xlu1 %v2710_v3, %s2923_s11 }
0x1874   : > { %v1724_v63 = vpop.permute.xlu0 %1723 }
0x1875   : > { %v1729_v11 = vmul.f32 %v1724_v63, %v1719_v1  ;;  %v2648_v63 = vld [vmem:[#allocation7 + $0x24] ss:$44 sps:$4 sm:$0xff]  }
0x1877   : > { %v3475_v9 = vadd.f32 %v1731_v32, %v1729_v11 }
0x1878   : > { %v1726_v31 = vpop.permute.xlu1 %1725 }
0x1879   : > { %v1730_v8 = vmul.f32 %v1726_v31, %v1720_v6 }
0x187b   : > { %v3477_v12 = vadd.f32 %v1732_v7, %v1730_v8 }
0x187d   : > { %v1735_v22 = vpack.c.bf16 %v3477_v12, %v3475_v9 }
0x187f   : > { %1737 = vrot.lane.b32.xlu0 %v1735_v22, %s2923_s11 }
0x18f1   : > { %v1738_v23 = vpop.permute.xlu0 %1737 }
0x18f2   : > { %2305 = vmatmul.mubr.msk.bf16.vlgmr.msra.gmra.mxu1 %vm312_vm1, %v1738_v23 }
0x18f3   : > { %2510 = vmatprep.mubr.msk.bf16.mxu1 %vm2920_vm0, %v2919_v0 }
0x19b2   : > { %v1776_v13 = vpop.f32.mrf.mxu1 }
0x19b3   : > { %v1777_v5 = vadd.f32 %v1776_v13, %v3277_v59 }
0x19b4   : > { %v1778_v4 = vpop.f32.mrf.mxu1 }
0x19b5   : > { %v1779_v19 = vadd.f32 %v1778_v4, %v3281_v60  ;;  %v1785_v27 = vmax.f32 %v1777_v5, 0.0 }
0x19b6   : > { %v1780_v26 = vpop.f32.mrf.mxu1 }
0x19b7   : > { %v1781_v14 = vadd.f32 %v1780_v26, %v3277_v59  ;;  %1935 = vrot.lane.b32.xlu1 %v1779_v19, %s2922_s21  ;;  %v2649_v26 = vld [vmem:[#allocation7 + $0x80] ss:$44 sps:$4 sm:$0xff]  }
0x19b8   : > { %v1782_v17 = vpop.f32.mrf.mxu1 }
0x19b9   : > { %v1786_v18 = vmax.f32 %v1781_v14, 0.0  ;;  %v1783_v21 = vadd.f32 %v1782_v17, %v3281_v60  ;;  %v2650_v14 = vld [vmem:[#allocation7 + $0x28] ss:$44 sps:$4 sm:$0xff]   ;;  %v2309_v17 = vld [vmem:[#allocation8 + $0x9] ss:$0 sm:$0xff] }
0x19bb   : > { %v1787_v20 = vpack.c.bf16 %v1786_v18, %v1785_v27  ;;  %1937 = vrot.lane.b32.xlu0 %v1783_v21, %s2922_s21 }
0x19bd   : > { %2505 = vmatmul.mubr.msk.bf16.vlgmr.msra.gmra.mxu0 %vm312_vm1, %v1787_v20 }
0x19be   : > { %2515 = vmatpush3.bf16.msra.mxu0 %v3306_v29  ;;  %2518 = vmatprep.mubr.msk.bf16.mxu0 %vm2920_vm0, %v2919_v0 }
0x19bf   : > { %2516 = vmatprep.subr.bf16.mxu0 %v2919_v0 }
0x19c2   : > { %2517 = vmatpush3.bf16.msra.mxu0 %v3310_v30 }
0x19c3   : > { %2530 = vmatprep.subr.bf16.mxu0 %v2919_v0 }
0x1a29   : > { %v1936_v53 = vpop.permute.xlu1 %1935 }
0x1a7d   : > { %v1825_v59 = vpop.f32.mrf.mxu0 }
0x1a7e   : > { %v1826_v60 = vadd.f32 %v3292_v24, %v1825_v59 }
0x1a7f   : > { %v2506_v48 = vpop.f32.mrf.mxu0 }
0x1a81   : > { %v1828_v40 = vpop.f32.mrf.mxu0 }
0x1a82   : > { %v1829_v49 = vadd.f32 %v3292_v24, %v1828_v40 }
0x1a83   : > { %v2507_v25 = vpop.f32.mrf.mxu0 }
0x1a84   : > { %v1832_v33 = vpack.c.bf16 %v1829_v49, %v1826_v60  ;;  %v2313_v60 = vld [vmem:[#allocation8 + $0xa] ss:$0 sm:$0xff] }
0x1a86   : > { %2509 = vmatpush3.bf16.msra.mxu1 %v1832_v33 }
0x1a87   : > { %2522 = vmatprep.subr.bf16.mxu1 %v2919_v0 }
0x1a89   : > { %2511 = vmatmul.mubr.msk.bf16.vlgmr.msra.gmra.mxu1 %vm516_vm2, %v3296_v28 }
0x1a8a   : > { %2526 = vmatprep.mubr.msk.bf16.mxu1 %vm2920_vm0, %v2919_v0  ;;  %2523 = vmatpush3.bf16.msra.mxu1 %v2647_v2 }
0x1a8b   : > { %2524 = vmatprep.subr.bf16.mxu1 %v2919_v0 }
0x1a8e   : > { %2525 = vmatpush3.bf16.msra.mxu1 %v2648_v63 }
0x1b49   : > { %v1867_v29 = vpop.f32.mrf.mxu1 }
0x1b4b   : > { %v2512_v30 = vpop.f32.mrf.mxu1 }
0x1b4d   : > { %v1870_v10 = vpop.f32.mrf.mxu1 }
0x1b4e   : > { %v1874_v47 = vpack.c.bf16 %v1870_v10, %v1867_v29 }
0x1b4f   : > { %v2513_v34 = vpop.f32.mrf.mxu1 }
0x1b50   : > { %2519 = vmatmul.mubr.msk.bf16.vlgmr.msra.gmra.mxu0 %vm312_vm1, %v1874_v47 }
0x1b51   : > { %2534 = vmatprep.mubr.msk.bf16.mxu0 %vm2920_vm0, %v2919_v0  ;;  %2531 = vmatpush3.bf16.msra.mxu0 %v2649_v26 }
0x1b52   : > { %2532 = vmatprep.subr.bf16.mxu0 %v2919_v0 }
0x1b55   : > { %2533 = vmatpush3.bf16.msra.mxu0 %v2650_v14 }
0x1c10   : > { %v1912_v24 = vpop.f32.mrf.mxu0 }
0x1c11   : > { %v1913_v35 = vadd.f32 %v3321_v41, %v1912_v24 }
0x1c12   : > { %v2520_v36 = vpop.f32.mrf.mxu0 }
0x1c13   : > { %v1919_v38 = vadd.f32 %v1913_v35, %v1779_v19 }
0x1c14   : > { %v1915_v37 = vpop.f32.mrf.mxu0 }
0x1c15   : > { %v1921_v28 = vsub.f32 0.0, %v1919_v38  ;;  %v1916_v39 = vadd.f32 %v3321_v41, %v1915_v37  ;;  %v1938_v41 = vpop.permute.xlu0 %1937 }
0x1c16   : > { %v2521_v56 = vpop.f32.mrf.mxu0 }
0x1c17   : > { %v1923_v43 = vmul.f32 1.442695, %v1921_v28  ;;  %v1920_v44 = vadd.f32 %v1916_v39, %v1783_v21 }
0x1c19   : > { %2711 = vpow2.f32 %v1923_v43  ;;  %v1922_v42 = vsub.f32 0.0, %v1920_v44 }
0x1c1b   : > { %v1925_v15 = vmul.f32 1.442695, %v1922_v42 }
0x1c1d   : > { %2713 = vpow2.f32 %v1925_v15 }
0x1c26   : > { %v2712_v57 = vpop.eup %2711 }
0x1c27   : > { %v1927_v45 = vadd.f32 1.0, %v2712_v57 }
0x1c29   : > { %2715 = vrcp.f32 %v1927_v45 }
0x1c2a   : > { %v2714_v46 = vpop.eup %2713 }
0x1c2b   : > { %v1928_v50 = vadd.f32 1.0, %v2714_v46 }
0x1c2d   : > { %2717 = vrcp.f32 %v1928_v50 }
0x1c36   : > { %v2716_v52 = vpop.eup %2715 }
0x1c37   : > { %v1941_v16 = vmul.f32 %v2716_v52, %v1936_v53  ;;  %v1955_v6 = vsub.f32 1.0, %v2716_v52  ;;  %v1967_v8 = vmul.f32 %v2716_v52, %v3475_v9 }
0x1c39   : > { %1945 = vrot.lane.b32.xlu1 %v1941_v16, %s2922_s21 }
0x1c3a   : > { %v2718_v55 = vpop.eup %2717 }
0x1c3b   : > { %v1942_v54 = vmul.f32 %v2718_v55, %v1938_v41  ;;  %v1956_v32 = vsub.f32 1.0, %v2718_v55  ;;  %v1968_v22 = vmul.f32 %v2718_v55, %v3477_v12 }
0x1c3d   : > { %1947 = vrot.lane.b32.xlu0 %v1942_v54, %s2922_s21 }
0x1cab   : > { %v1946_v58 = vpop.permute.xlu1 %1945 }
0x1cac   : > { %v1951_v61 = vadd.f32 %v1946_v58, %v1913_v35 }
0x1cae   : > { %2719 = vtanh.f32 %v1951_v61 }
0x1caf   : > { %v1948_v51 = vpop.permute.xlu0 %1947 }
0x1cb0   : > { %v1952_v62 = vadd.f32 %v1948_v51, %v1916_v39 }
0x1cb2   : > { %2721 = vtanh.f32 %v1952_v62 }
0x1cbb   : > { %v2720_v3 = vpop.eup %2719 }
0x1cbc   : > { %1959 = vrot.lane.b32.xlu1 %v2720_v3, %s2923_s11 }
0x1cbf   : > { %v2722_v1 = vpop.eup %2721 }
0x1cc0   : > { %1961 = vrot.lane.b32.xlu0 %v2722_v1, %s2923_s11 }
0x1d2e   : > { %v1960_v11 = vpop.permute.xlu1 %1959 }
0x1d2f   : > { %v1965_v31 = vmul.f32 %v1960_v11, %v1955_v6 }
0x1d31   : > { %v1969_v13 = vadd.f32 %v1967_v8, %v1965_v31 }
0x1d32   : > { %v1962_v7 = vpop.permute.xlu0 %1961 }
0x1d33   : > { %v1966_v23 = vmul.f32 %v1962_v7, %v1956_v32 }
0x1d35   : > { %v1970_v4 = vadd.f32 %v1968_v22, %v1966_v23 }
0x1d37   : > { %v1975_v5 = vpack.c.bf16 %v1970_v4, %v1969_v13 }
0x1d39   : > { %1984 = vrot.lane.b32.xlu1 %v1975_v5, %s2923_s11 }
0x1dab   : > { %v1985_v19 = vpop.permute.xlu1 %1984 }
0x1dac   : > { %2527 = vmatmul.mubr.msk.bf16.vlgmr.msra.gmra.mxu1 %vm312_vm1, %v1985_v19 }
0x1e6c   : > { %v2035_v9 = vpop.f32.mrf.mxu1 }
0x1e6d   : > { %v2036_v27 = vadd.f32 %v2309_v17, %v2035_v9 }
0x1e6e   : > { %v2528_v12 = vpop.f32.mrf.mxu1 }
0x1e6f   : > { %v2042_v59 = vmax.f32 %v2036_v27, 0.0 }
0x1e70   : > { %v2038_v18 = vpop.f32.mrf.mxu1 }
0x1e71   : > { %v2039_v21 = vadd.f32 %v2309_v17, %v2038_v18 }
0x1e72   : > { %v2529_v20 = vpop.f32.mrf.mxu1 }
0x1e73   : > { %v2043_v48 = vmax.f32 %v2039_v21, 0.0 }
0x1e75   : > { %v2048_v40 = vpack.c.bf16 %v2043_v48, %v2042_v59 }
0x1e77   : > { %2535 = vmatmul.mubr.msk.bf16.vlgmr.msra.gmra.mxu0 %vm312_vm1, %v2048_v40 }
0x1f37   : > { %v2105_v49 = vpop.f32.mrf.mxu0 }
0x1f38   : > { %v2106_v0 = vadd.f32 %v2313_v60, %v2105_v49 }
0x1f39   : > { %v2536_v25 = vpop.f32.mrf.mxu0 }
0x1f3a   : > { %2112 = vst [vmem:[%s282_s9] sm:$0xff] %v2106_v0 }
0x1f3b   : > { %v2108_v33 = vpop.f32.mrf.mxu0 }
0x1f3c   : > { %v2109_v29 = vadd.f32 %v2313_v60, %v2108_v33 }
0x1f3d   : > { %v2537_v30 = vpop.f32.mrf.mxu0 }
0x1f3e   : > { %2113 = vst [vmem:[%s282_s9 + $0x8] sm:$0xff] %v2109_v29 }
0x1f3f   : > { %2844 = shalt.err (!%p2841_p6)
}
0x1f40   : > { %s2845_s30 = scalar_lea.hbm %s3529_s26, 256  ;;  %s2849_s7 = scalar_lea.hbm %s3576_s4, 512 }
0x1f41   : > { %p2846_p1 = scmp.ne.s32.totalorder %s3529_s26, %s2845_s30  ;;  %p2850_p11 = scmp.lt.s32.totalorder %s3529_s26, %s3576_s4 }
0x1f42   : > { %p2851_p9 = scmp.lt.s32.totalorder %s2849_s7, %s2845_s30 }
0x1f43   : > { %p2847_p10 = pnand %p2846_p1, %p3596_p13 }
0x1f44   : > { %p2852_p12 = por %p2851_p9, %p2850_p11 }
0x1f45   : > { %p2848_p8 = pneg %p2847_p10 }
0x1f47   : > { %p2853_p7 = pnand %p2852_p12, %p2848_p8 }
0x1f49   : > { %2856 = shalt.err (!%p2853_p7)
}
0x1f4a   : > { %s2926_s11 = smov 128   ;;  %s2927_s6 = smov 8  }
0x1f4b   : > { %2550 = dma.vmem_to_hbm [thread:$0]  (%p3596_p13), %s3524_s10, 256, %s3529_s26, %s2115_s2, %s2926_s11, %s2926_s11, %s2927_s6  }
0x1f4c PF: > { %s2143_s9 = sand.u32 1, %s2895_s15   ;;  %p3597_p0 = scmp.ne.s32.totalorder %s3583_s22, 0 }
0x1f4d   : > { %p3598_p5 = scmp.ge.s32.totalorder %s2907_s18, 2  ;;  %s2144_s8 = scalar_lea.sflag [#allocation4], %s2143_s9 }
0x1f4f   : > { %p2567_p3 = pnand %p3598_p5, %p3597_p0 }
0x1f51   : > { %p2568_p2 = pneg %p2567_p3 }
0x1f53   : > { %2890 = dma.done.wait (%p2568_p2), %s2144_s8, 256  }
0x1f54   : > { %2892 = vsyncadd (%p2568_p2), %s2144_s8, 4294967040  ;;  %p21_p4 = scmp.ge.s32.totalorder %s3025_s12, 4   ;;  %s3599_s15 = smov %s2899_s16 }
0x1f55   : > { %s3600_s16 = smov %s2903_s17  ;;  %s3601_s17 = smov %s3041_s24 }
0x1f56   : > { %s3602_s18 = smov %s3025_s12  ;;  %23 = sbr.rel (!%p21_p4) target bundleno = 11 (0xb), region = 102 }
0x1f5b   :  { %2149 = vsyncpa [#allocation3], 1 }
0x1f5c   :  { %2151 = vsyncpa [#allocation3 + $0x1], 1 }
0x1f5d   :  { %2152 = vsyncpa [#allocation6], 1 }
0x1f5e   :  { %2154 = vsyncpa [#allocation6 + $0x1], 1 }
0x1f5f   :  { %2155 = vsyncpa [#allocation9], 1 }
0x1f60   :  { %2156 = vsyncpa [#allocation4], 1 }
0x1f61   :  { %2158 = vsyncpa [#allocation4 + $0x1], 1 }

</bundles_post_ra>
